<compile_context>
chip_gen: v7x
topology: tpu7x:2x2x1
jax: 0.10.0
libtpu: 0.0.40
codegen_flags: <defaults>
</compile_context>

<pallas_src>
import numpy as np
import jax
import jax.numpy as jnp
from jax import lax
from jax.experimental import pallas as pl
from jax.experimental.pallas import tpu as pltpu

# channel / width constants fixed by the PyTorch module
C1, C2, C3 = 8, 4, 2          # conv channels (1x1 -> 8, 3x3 -> 4, 3x3 -> 2)
NL1, NL2, NL3 = 32, 64, 48    # linear-net widths


# --------------------------------------------------------------------------
# Fused ConvNet + LinearNet kernel (one batch block per grid step)
# --------------------------------------------------------------------------
def actcond_kernel(x_ref,
                   t1_ref, b1_ref, t2_ref, b2_ref, t3_ref, b3_ref,
                   wl1s_ref, mask_ref, fold_ref, bl1_ref,
                   wl2_ref, bl2_ref, wl3_ref, bl3_ref,
                   wl4_ref, bl4_ref,
                   out_ref,
                   y1_s, y2_s):
    f32 = jnp.float32
    R = x_ref.shape[0]          # BB * H rows in this batch block
    BB = out_ref.shape[0]
    H = R // BB                 # image height (multiple of 8 keeps reshapes free)
    WC1 = t1_ref.shape[1]       # W  * C1
    WC2 = t2_ref.shape[2]       # W2 * C2

    # ---- conv1: 1x1, ReLU — one block-diagonal matmul over all rows ----
    y1 = jnp.maximum(
        jnp.dot(x_ref[...], t1_ref[...], preferred_element_type=f32) + b1_ref[...],
        0.0)                                            # (R, W*C1): 128 dense lanes

    # stash + zero the pad rows so the row-shifted slabs below stay in bounds
    y1_s[0:R, :] = y1
    y1_s[R:R + 8, :] = jnp.zeros((8, WC1), f32)

    # ---- conv2: 3x3 valid, ReLU — 3 row-shift taps, columns folded in t2[dy] ----
    acc2 = jnp.dot(y1, t2_ref[0], preferred_element_type=f32)
    acc2 = acc2 + jnp.dot(y1_s[1:R + 1, :], t2_ref[1], preferred_element_type=f32)
    acc2 = acc2 + jnp.dot(y1_s[2:R + 2, :], t2_ref[2], preferred_element_type=f32)
    y2 = jnp.maximum(acc2 + b2_ref[...], 0.0)           # (R, W2*C2); rows i>=H-2 unused

    y2_s[0:R, :] = y2
    y2_s[R:R + 8, :] = jnp.zeros((8, WC2), f32)

    # ---- conv3: 3x3 valid, ReLU ----
    acc3 = jnp.dot(y2, t3_ref[0], preferred_element_type=f32)
    acc3 = acc3 + jnp.dot(y2_s[1:R + 1, :], t3_ref[1], preferred_element_type=f32)
    acc3 = acc3 + jnp.dot(y2_s[2:R + 2, :], t3_ref[2], preferred_element_type=f32)
    y3 = jnp.maximum(acc3 + b3_ref[...], 0.0)           # (R, W3*C3); rows i>=H-4 unused

    # ---- linear-1 (2*H3*W3 -> 32), ReLU — MXU formulation of the per-image flatten:
    #   g[r, i*32+o] = <y3 row r, wl1 slice for image-row i>
    #   mask keeps only i == (r mod H), i < H3 (also kills the conv garbage rows),
    #   sum the H rows of each image, then fold the H3 lane blocks with `fold`.
    g = jnp.dot(y3, wl1s_ref[...], preferred_element_type=f32) * mask_ref[...]
    s = jnp.sum(g.reshape(BB, H, g.shape[1]), axis=1)   # (BB, H3*32)
    h = jnp.maximum(jnp.dot(s, fold_ref[...], preferred_element_type=f32)
                    + bl1_ref[...], 0.0)

    # ---- linear-2 / linear-3 / ZeroWeightLinear(data_zero) ----
    h = jnp.maximum(jnp.dot(h, wl2_ref[...], preferred_element_type=f32)
                    + bl2_ref[...], 0.0)
    h = jnp.maximum(jnp.dot(h, wl3_ref[...], preferred_element_type=f32)
                    + bl3_ref[...], 0.0)
    out_ref[...] = jnp.dot(h, wl4_ref[...], preferred_element_type=f32) + bl4_ref[...]


# --------------------------------------------------------------------------
# Wrapper
# --------------------------------------------------------------------------
def act_cond_net_forward(cond_input_nchw, data_batch_nchw, params):
    B, Cc, H, W = cond_input_nchw.shape
    Ci = int(data_batch_nchw.shape[1])
    F = 2 * Ci
    H3 = H - 4

    # data_zero bias of the ZeroWeightLinear layer (torch.std is unbiased, ddof=1).
    # Done with plain jnp in the wrapper per the perf review (a standalone kernel
    # launch + HBM round trip for an 8 KB reduction was pure overhead).
    flat = jnp.transpose(data_batch_nchw, (1, 0, 2, 3)).reshape(Ci, -1)
    bl4 = jnp.concatenate([1.0 / (jnp.std(flat, axis=1, ddof=1) + 1e-6),
                           -jnp.mean(flat, axis=1)])[None, :]

    # batch block size (per-step footprint is ~tens of KB, far under any VMEM limit)
    if B <= 64:
        BB = B
    elif B % 64 == 0:
        BB = 64
    else:
        BB = B
    grid = (B // BB,)

    # fold (b, i) onto rows and (j, chan) onto lanes: x_rows[b*H+i, j*Cc+c] = x[b,c,i,j]
    x_rows = jnp.transpose(cond_input_nchw, (0, 2, 3, 1)).reshape(B * H, W * Cc)

    # row-index mask used by the linear-1 diagonal extraction (same for every block)
    mask = np.zeros((BB * H, H3 * NL1), np.float32)
    for i in range(H3):
        for b in range(BB):
            mask[b * H + i, i * NL1:(i + 1) * NL1] = 1.0
    mask = jnp.asarray(mask)

    weight_args = [params["t1"], params["b1"], params["t2"], params["b2"],
                   params["t3"], params["b3"], params["wl1s"], mask, params["fold"],
                   params["bl1"], params["wl2"], params["bl2"], params["wl3"],
                   params["bl3"], params["wl4"], bl4]

    def full_spec(a):
        r = a.ndim
        return pl.BlockSpec(a.shape, lambda g, _r=r: (0,) * _r)

    in_specs = [pl.BlockSpec((BB * H, W * Cc), lambda g: (g, 0))]
    in_specs += [full_spec(a) for a in weight_args]

    out = pl.pallas_call(
        actcond_kernel,
        out_shape=jax.ShapeDtypeStruct((B, F), jnp.float32),
        grid=grid,
        in_specs=in_specs,
        out_specs=pl.BlockSpec((BB, F), lambda g: (g, 0)),
        scratch_shapes=[
            pltpu.VMEM((BB * H + 8, W * C1), jnp.float32),        # conv1 activations
            pltpu.VMEM((BB * H + 8, (W - 2) * C2), jnp.float32),  # conv2 activations
        ],
        compiler_params=pltpu.CompilerParams(dimension_semantics=("parallel",)),
    )(x_rows, *weight_args)

    # PyTorch: out.view(B, 2, out_channels // 2)
    return out.reshape(B, 2, Ci)


# --------------------------------------------------------------------------
# Parameters: PyTorch layouts + re-packing into the kernel's folded layouts
# --------------------------------------------------------------------------
def init_torch_params(key, cond_shape, inp_shape):
    """Deterministic params in PyTorch layouts (Conv2d (O,I,kh,kw); Linear (out,in))."""
    Cc, H, W = cond_shape
    Ci = inp_shape[0]
    H3, W3 = H - 4, W - 4
    flat_len = C3 * H3 * W3
    ks = jax.random.split(key, 12)

    def u(k, shape, fan_in):
        bound = 1.0 / np.sqrt(fan_in)
        return jax.random.uniform(k, shape, jnp.float32, -bound, bound)

    return dict(
        w1=u(ks[0], (C1, Cc, 1, 1), Cc),          b1=u(ks[1], (C1,), Cc),
        w2=u(ks[2], (C2, C1, 3, 3), C1 * 9),      b2=u(ks[3], (C2,), C1 * 9),
        w3=u(ks[4], (C3, C2, 3, 3), C2 * 9),      b3=u(ks[5], (C3,), C2 * 9),
        wl1=u(ks[6], (NL1, flat_len), flat_len),  bl1=u(ks[7], (NL1,), flat_len),
        wl2=u(ks[8], (NL2, NL1), NL1),            bl2=u(ks[9], (NL2,), NL1),
        wl3=u(ks[10], (NL3, NL2), NL2),           bl3=u(ks[11], (NL3,), NL2),
        wl4=jnp.zeros((2 * Ci, NL3), jnp.float32),   # ZeroWeightLinear: weight == 0
    )


def fold_params(tp, cond_shape):
    """Re-pack PyTorch-layout weights into the lane-folded layouts the kernel uses."""
    Cc, H, W = cond_shape
    W2, W3 = W - 2, W - 4
    H3 = H - 4

    # conv1 (1x1) as a block-diagonal (W*Cc, W*C1) matrix acting on whole rows
    w1 = np.asarray(tp["w1"])[:, :, 0, 0]                 # (C1, Cc)
    t1 = np.zeros((W * Cc, W * C1), np.float32)
    for j in range(W):
        t1[j * Cc:(j + 1) * Cc, j * C1:(j + 1) * C1] = w1.T
    b1f = np.tile(np.asarray(tp["b1"]), W)[None, :]

    # 3x3 convs: one banded (Toeplitz-in-width) matrix per kernel row dy
    def band(w, win, wout):
        cout, cin = w.shape[:2]
        t = np.zeros((3, win * cin, wout * cout), np.float32)
        for dy in range(3):
            for dx in range(3):
                blk = w[:, :, dy, dx].T                   # (cin, cout)
                for j in range(wout):
                    t[dy, (j + dx) * cin:(j + dx + 1) * cin,
                      j * cout:(j + 1) * cout] = blk
        return t

    t2 = band(np.asarray(tp["w2"]), W, W2)
    b2f = np.tile(np.asarray(tp["b2"]), W2)[None, :]
    t3 = band(np.asarray(tp["w3"]), W2, W3)
    b3f = np.tile(np.asarray(tp["b3"]), W3)[None, :]

    # linear-1: torch consumes the CHW-flattened conv3 output; re-index it to the
    # kernel's (image-row i, lane = j*C3 + c) layout and stack the H3 per-row slices
    # along the output axis: wl1s[j*C3+c, i*32+o] = wl1[o, c*H3*W3 + i*W3 + j]
    wl1 = np.asarray(tp["wl1"])                                 # (32, C3*H3*W3)
    wl1f = wl1.reshape(NL1, C3, H3, W3).transpose(2, 3, 1, 0)   # (H3, W3, C3, 32)
    wl1s = (wl1f.reshape(H3, W3 * C3, NL1)
                .transpose(1, 0, 2).reshape(W3 * C3, H3 * NL1))
    fold = np.tile(np.eye(NL1, dtype=np.float32), (H3, 1))      # (H3*32, 32)

    return dict(
        t1=jnp.asarray(t1), b1=jnp.asarray(b1f),
        t2=jnp.asarray(t2), b2=jnp.asarray(b2f),
        t3=jnp.asarray(t3), b3=jnp.asarray(b3f),
        wl1s=jnp.asarray(wl1s), fold=jnp.asarray(fold),
        bl1=jnp.asarray(np.asarray(tp["bl1"])[None, :]),
        wl2=jnp.asarray(np.asarray(tp["wl2"]).T),
        bl2=jnp.asarray(np.asarray(tp["bl2"])[None, :]),
        wl3=jnp.asarray(np.asarray(tp["wl3"]).T),
        bl3=jnp.asarray(np.asarray(tp["bl3"])[None, :]),
        wl4=jnp.asarray(np.asarray(tp["wl4"]).T),
    )


# --------------------------------------------------------------------------
# Pure-JAX reference of ActCondNet.forward (for the structural self-check)
# --------------------------------------------------------------------------
def ref_forward(cond_nchw, data_nchw, tp):
    hp = lax.Precision.HIGHEST
    B = cond_nchw.shape[0]
    Ci = data_nchw.shape[1]
    dn = ("NCHW", "OIHW", "NCHW")

    def conv(x, w, b):
        y = lax.conv_general_dilated(x, w, (1, 1), "VALID",
                                     dimension_numbers=dn, precision=hp)
        return jnp.maximum(y + b[None, :, None, None], 0.0)

    y = conv(cond_nchw, tp["w1"], tp["b1"])
    y = conv(y, tp["w2"], tp["b2"])
    y = conv(y, tp["w3"], tp["b3"])
    h = y.reshape(B, -1)                                  # NCHW flatten, as in torch
    h = jnp.maximum(jnp.dot(h, tp["wl1"].T, precision=hp) + tp["bl1"], 0.0)
    h = jnp.maximum(jnp.dot(h, tp["wl2"].T, precision=hp) + tp["bl2"], 0.0)
    h = jnp.maximum(jnp.dot(h, tp["wl3"].T, precision=hp) + tp["bl3"], 0.0)

    flat = jnp.transpose(data_nchw, (1, 0, 2, 3)).reshape(Ci, -1)
    bias = jnp.concatenate([1.0 / (jnp.std(flat, axis=1, ddof=1) + 1e-6),
                            -jnp.mean(flat, axis=1)])
    out = jnp.dot(h, tp["wl4"].T, precision=hp) + bias[None, :]
    return out.reshape(B, 2, Ci)


if __name__ == "__main__":
    key = jax.random.PRNGKey(0)
    k_cond, k_data, k_par, k_w4 = jax.random.split(key, 4)

    cond_shape = (4, 16, 16)    # (C, H, W) of the conditioning input
    inp_shape = (4, 16, 16)     # (C, H, W) of the flow / data input
    B = 2

    cond_input = jax.random.normal(k_cond, (B,) + cond_shape, jnp.float32)   # NCHW
    data_batch = jax.random.normal(k_data, (B,) + inp_shape, jnp.float32)    # NCHW

    torch_params = init_torch_params(k_par, cond_shape, inp_shape)
    kernel_params = fold_params(torch_params, cond_shape)

    out = act_cond_net_forward(cond_input, data_batch, kernel_params)
    out = jax.block_until_ready(out)
    assert out.shape == (B, 2, inp_shape[0]), out.shape

    # Check 1 -- module-faithful: the last layer is ZeroWeightLinear(data_zero) with
    # weight == 0, so the output must equal the data-dependent bias for every sample.
    dnp = np.asarray(data_batch, np.float64)
    flat = dnp.transpose(1, 0, 2, 3).reshape(inp_shape[0], -1)
    expected = np.concatenate([1.0 / (flat.std(axis=1, ddof=1) + 1e-6),
                               -flat.mean(axis=1)]).reshape(1, 2, inp_shape[0])
    np.testing.assert_allclose(np.asarray(out),
                               np.broadcast_to(expected, out.shape),
                               rtol=1e-4, atol=1e-4)

    # Check 2 -- structural: with a non-zero last-layer weight the full conv+linear
    # path must match the pure-JAX reference (check 1 cannot see it since wl4 == 0).
    tp2 = dict(torch_params)
    tp2["wl4"] = jax.random.uniform(k_w4, (2 * inp_shape[0], NL3),
                                    jnp.float32, -0.2, 0.2)
    out2 = act_cond_net_forward(cond_input, data_batch, fold_params(tp2, cond_shape))
    ref2 = ref_forward(cond_input, data_batch, tp2)
    out2, ref2 = jax.block_until_ready((out2, ref2))
    np.testing.assert_allclose(np.asarray(out2), np.asarray(ref2),
                               rtol=2e-2, atol=2e-2)

    print("KERNEL_OK")
</pallas_src>

<mosaic_0001>
module attributes {stable_mosaic.version = 11 : i64} {
  func.func @actcond_kernel(%arg0: i32, %arg1: memref<32x64xf32, #tpu.memory_space<vmem>>, %arg2: memref<64x128xf32, #tpu.memory_space<vmem>>, %arg3: memref<1x128xf32, #tpu.memory_space<vmem>>, %arg4: memref<3x128x56xf32, #tpu.memory_space<vmem>>, %arg5: memref<1x56xf32, #tpu.memory_space<vmem>>, %arg6: memref<3x56x24xf32, #tpu.memory_space<vmem>>, %arg7: memref<1x24xf32, #tpu.memory_space<vmem>>, %arg8: memref<24x384xf32, #tpu.memory_space<vmem>>, %arg9: memref<32x384xf32, #tpu.memory_space<vmem>>, %arg10: memref<384x32xf32, #tpu.memory_space<vmem>>, %arg11: memref<1x32xf32, #tpu.memory_space<vmem>>, %arg12: memref<32x64xf32, #tpu.memory_space<vmem>>, %arg13: memref<1x64xf32, #tpu.memory_space<vmem>>, %arg14: memref<64x48xf32, #tpu.memory_space<vmem>>, %arg15: memref<1x48xf32, #tpu.memory_space<vmem>>, %arg16: memref<48x8xf32, #tpu.memory_space<vmem>>, %arg17: memref<1x8xf32, #tpu.memory_space<vmem>>, %arg18: memref<2x8xf32, #tpu.memory_space<vmem>>, %arg19: memref<40x128xf32, #tpu.memory_space<vmem>>, %arg20: memref<40x56xf32, #tpu.memory_space<vmem>>) attributes {dimension_semantics = [#tpu.dimension_semantics<parallel>], iteration_bounds = array<i64: 1>, scalar_prefetch = 0 : i64, scratch_operands = 2 : i64, tpu.core_type = #tpu.core_type<tc>, window_params = [{transform_indices = @transform_0, window_bounds = array<i64: 32, 64>}, {pipeline_mode = #tpu.pipeline_mode<synchronous>, transform_indices = @transform_1, window_bounds = array<i64: 64, 128>}, {pipeline_mode = #tpu.pipeline_mode<synchronous>, transform_indices = @transform_2, window_bounds = array<i64: 1, 128>}, {pipeline_mode = #tpu.pipeline_mode<synchronous>, transform_indices = @transform_3, window_bounds = array<i64: 3, 128, 56>}, {pipeline_mode = #tpu.pipeline_mode<synchronous>, transform_indices = @transform_4, window_bounds = array<i64: 1, 56>}, {pipeline_mode = #tpu.pipeline_mode<synchronous>, transform_indices = @transform_5, window_bounds = array<i64: 3, 56, 24>}, {pipeline_mode = #tpu.pipeline_mode<synchronous>, transform_indices = @transform_6, window_bounds = array<i64: 1, 24>}, {pipeline_mode = #tpu.pipeline_mode<synchronous>, transform_indices = @transform_7, window_bounds = array<i64: 24, 384>}, {pipeline_mode = #tpu.pipeline_mode<synchronous>, transform_indices = @transform_8, window_bounds = array<i64: 32, 384>}, {pipeline_mode = #tpu.pipeline_mode<synchronous>, transform_indices = @transform_9, window_bounds = array<i64: 384, 32>}, {pipeline_mode = #tpu.pipeline_mode<synchronous>, transform_indices = @transform_10, window_bounds = array<i64: 1, 32>}, {pipeline_mode = #tpu.pipeline_mode<synchronous>, transform_indices = @transform_11, window_bounds = array<i64: 32, 64>}, {pipeline_mode = #tpu.pipeline_mode<synchronous>, transform_indices = @transform_12, window_bounds = array<i64: 1, 64>}, {pipeline_mode = #tpu.pipeline_mode<synchronous>, transform_indices = @transform_13, window_bounds = array<i64: 64, 48>}, {pipeline_mode = #tpu.pipeline_mode<synchronous>, transform_indices = @transform_14, window_bounds = array<i64: 1, 48>}, {pipeline_mode = #tpu.pipeline_mode<synchronous>, transform_indices = @transform_15, window_bounds = array<i64: 48, 8>}, {pipeline_mode = #tpu.pipeline_mode<synchronous>, transform_indices = @transform_16, window_bounds = array<i64: 1, 8>}, {transform_indices = @transform_17, window_bounds = array<i64: 2, 8>}]} {
    %c0 = arith.constant 0 : index
    %c0_0 = arith.constant 0 : index
    %0 = vector.load %arg1[%c0, %c0_0] : memref<32x64xf32, #tpu.memory_space<vmem>>, vector<32x64xf32>
    %c0_1 = arith.constant 0 : index
    %c0_2 = arith.constant 0 : index
    %1 = vector.load %arg2[%c0_1, %c0_2] : memref<64x128xf32, #tpu.memory_space<vmem>>, vector<64x128xf32>
    %cst = arith.constant dense<0.000000e+00> : vector<32x128xf32>
    %2 = tpu.matmul %0, %1, %cst {dimension_numbers = #tpu.dot_dimension_numbers<[1], [0], [0], [1], [0, 0, 1, 1], [], []>} : vector<32x64xf32>, vector<64x128xf32>, vector<32x128xf32> -> vector<32x128xf32>
    %c0_3 = arith.constant 0 : index
    %c0_4 = arith.constant 0 : index
    %3 = vector.load %arg3[%c0_3, %c0_4] : memref<1x128xf32, #tpu.memory_space<vmem>>, vector<1x128xf32>
    %4 = vector.broadcast %3 : vector<1x128xf32> to vector<32x128xf32>
    %5 = arith.addf %2, %4 : vector<32x128xf32>
    %cst_5 = arith.constant 0.000000e+00 : f32
    %6 = vector.broadcast %cst_5 : f32 to vector<32x128xf32>
    %7 = arith.maximumf %5, %6 : vector<32x128xf32>
    %c0_6 = arith.constant 0 : index
    %c0_7 = arith.constant 0 : index
    %8 = vector.load %arg19[%c0_6, %c0_7] : memref<40x128xf32, #tpu.memory_space<vmem>>, vector<32x128xf32>
    tpu.vector_store %arg19[%c0_6, %c0_7], %7 {strides = array<i32>} : memref<40x128xf32, #tpu.memory_space<vmem>>, vector<32x128xf32>,
    %cst_8 = arith.constant 0.000000e+00 : f32
    %9 = vector.broadcast %cst_8 : f32 to vector<8x128xf32>
    %c32 = arith.constant 32 : index
    %c0_9 = arith.constant 0 : index
    %10 = vector.load %arg19[%c32, %c0_9] : memref<40x128xf32, #tpu.memory_space<vmem>>, vector<8x128xf32>
    tpu.vector_store %arg19[%c32, %c0_9], %9 {strides = array<i32>} : memref<40x128xf32, #tpu.memory_space<vmem>>, vector<8x128xf32>,
    %c0_10 = arith.constant 0 : index
    %c0_11 = arith.constant 0 : index
    %c0_12 = arith.constant 0 : index
    %11 = vector.load %arg4[%c0_10, %c0_11, %c0_12] : memref<3x128x56xf32, #tpu.memory_space<vmem>>, vector<1x128x56xf32>
    %12 = vector.shape_cast %11 : vector<1x128x56xf32> to vector<128x56xf32>
    %cst_13 = arith.constant dense<0.000000e+00> : vector<32x56xf32>
    %13 = tpu.matmul %7, %12, %cst_13 {dimension_numbers = #tpu.dot_dimension_numbers<[1], [0], [0], [1], [0, 0, 1, 1], [], []>} : vector<32x128xf32>, vector<128x56xf32>, vector<32x56xf32> -> vector<32x56xf32>
    %c1 = arith.constant 1 : index
    %c0_14 = arith.constant 0 : index
    %14 = vector.load %arg19[%c1, %c0_14] : memref<40x128xf32, #tpu.memory_space<vmem>>, vector<32x128xf32>
    %c1_15 = arith.constant 1 : index
    %c0_16 = arith.constant 0 : index
    %c0_17 = arith.constant 0 : index
    %15 = vector.load %arg4[%c1_15, %c0_16, %c0_17] : memref<3x128x56xf32, #tpu.memory_space<vmem>>, vector<1x128x56xf32>
    %16 = vector.shape_cast %15 : vector<1x128x56xf32> to vector<128x56xf32>
    %cst_18 = arith.constant dense<0.000000e+00> : vector<32x56xf32>
    %17 = tpu.matmul %14, %16, %cst_18 {dimension_numbers = #tpu.dot_dimension_numbers<[1], [0], [0], [1], [0, 0, 1, 1], [], []>} : vector<32x128xf32>, vector<128x56xf32>, vector<32x56xf32> -> vector<32x56xf32>
    %18 = arith.addf %13, %17 : vector<32x56xf32>
    %c2 = arith.constant 2 : index
    %c0_19 = arith.constant 0 : index
    %19 = vector.load %arg19[%c2, %c0_19] : memref<40x128xf32, #tpu.memory_space<vmem>>, vector<32x128xf32>
    %c2_20 = arith.constant 2 : index
    %c0_21 = arith.constant 0 : index
    %c0_22 = arith.constant 0 : index
    %20 = vector.load %arg4[%c2_20, %c0_21, %c0_22] : memref<3x128x56xf32, #tpu.memory_space<vmem>>, vector<1x128x56xf32>
    %21 = vector.shape_cast %20 : vector<1x128x56xf32> to vector<128x56xf32>
    %cst_23 = arith.constant dense<0.000000e+00> : vector<32x56xf32>
    %22 = tpu.matmul %19, %21, %cst_23 {dimension_numbers = #tpu.dot_dimension_numbers<[1], [0], [0], [1], [0, 0, 1, 1], [], []>} : vector<32x128xf32>, vector<128x56xf32>, vector<32x56xf32> -> vector<32x56xf32>
    %23 = arith.addf %18, %22 : vector<32x56xf32>
    %c0_24 = arith.constant 0 : index
    %c0_25 = arith.constant 0 : index
    %24 = vector.load %arg5[%c0_24, %c0_25] : memref<1x56xf32, #tpu.memory_space<vmem>>, vector<1x56xf32>
    %25 = vector.broadcast %24 : vector<1x56xf32> to vector<32x56xf32>
    %26 = arith.addf %23, %25 : vector<32x56xf32>
    %cst_26 = arith.constant 0.000000e+00 : f32
    %27 = vector.broadcast %cst_26 : f32 to vector<32x56xf32>
    %28 = arith.maximumf %26, %27 : vector<32x56xf32>
    %c0_27 = arith.constant 0 : index
    %c0_28 = arith.constant 0 : index
    %29 = vector.load %arg20[%c0_27, %c0_28] : memref<40x56xf32, #tpu.memory_space<vmem>>, vector<32x56xf32>
    tpu.vector_store %arg20[%c0_27, %c0_28], %28 {strides = array<i32>} : memref<40x56xf32, #tpu.memory_space<vmem>>, vector<32x56xf32>,
    %cst_29 = arith.constant 0.000000e+00 : f32
    %30 = vector.broadcast %cst_29 : f32 to vector<8x56xf32>
    %c32_30 = arith.constant 32 : index
    %c0_31 = arith.constant 0 : index
    %31 = vector.load %arg20[%c32_30, %c0_31] : memref<40x56xf32, #tpu.memory_space<vmem>>, vector<8x56xf32>
    tpu.vector_store %arg20[%c32_30, %c0_31], %30 {strides = array<i32>} : memref<40x56xf32, #tpu.memory_space<vmem>>, vector<8x56xf32>,
    %c0_32 = arith.constant 0 : index
    %c0_33 = arith.constant 0 : index
    %c0_34 = arith.constant 0 : index
    %32 = vector.load %arg6[%c0_32, %c0_33, %c0_34] : memref<3x56x24xf32, #tpu.memory_space<vmem>>, vector<1x56x24xf32>
    %33 = vector.shape_cast %32 : vector<1x56x24xf32> to vector<56x24xf32>
    %cst_35 = arith.constant dense<0.000000e+00> : vector<32x24xf32>
    %34 = tpu.matmul %28, %33, %cst_35 {dimension_numbers = #tpu.dot_dimension_numbers<[1], [0], [0], [1], [0, 0, 1, 1], [], []>} : vector<32x56xf32>, vector<56x24xf32>, vector<32x24xf32> -> vector<32x24xf32>
    %c1_36 = arith.constant 1 : index
    %c0_37 = arith.constant 0 : index
    %35 = vector.load %arg20[%c1_36, %c0_37] : memref<40x56xf32, #tpu.memory_space<vmem>>, vector<32x56xf32>
    %c1_38 = arith.constant 1 : index
    %c0_39 = arith.constant 0 : index
    %c0_40 = arith.constant 0 : index
    %36 = vector.load %arg6[%c1_38, %c0_39, %c0_40] : memref<3x56x24xf32, #tpu.memory_space<vmem>>, vector<1x56x24xf32>
    %37 = vector.shape_cast %36 : vector<1x56x24xf32> to vector<56x24xf32>
    %cst_41 = arith.constant dense<0.000000e+00> : vector<32x24xf32>
    %38 = tpu.matmul %35, %37, %cst_41 {dimension_numbers = #tpu.dot_dimension_numbers<[1], [0], [0], [1], [0, 0, 1, 1], [], []>} : vector<32x56xf32>, vector<56x24xf32>, vector<32x24xf32> -> vector<32x24xf32>
    %39 = arith.addf %34, %38 : vector<32x24xf32>
    %c2_42 = arith.constant 2 : index
    %c0_43 = arith.constant 0 : index
    %40 = vector.load %arg20[%c2_42, %c0_43] : memref<40x56xf32, #tpu.memory_space<vmem>>, vector<32x56xf32>
    %c2_44 = arith.constant 2 : index
    %c0_45 = arith.constant 0 : index
    %c0_46 = arith.constant 0 : index
    %41 = vector.load %arg6[%c2_44, %c0_45, %c0_46] : memref<3x56x24xf32, #tpu.memory_space<vmem>>, vector<1x56x24xf32>
    %42 = vector.shape_cast %41 : vector<1x56x24xf32> to vector<56x24xf32>
    %cst_47 = arith.constant dense<0.000000e+00> : vector<32x24xf32>
    %43 = tpu.matmul %40, %42, %cst_47 {dimension_numbers = #tpu.dot_dimension_numbers<[1], [0], [0], [1], [0, 0, 1, 1], [], []>} : vector<32x56xf32>, vector<56x24xf32>, vector<32x24xf32> -> vector<32x24xf32>
    %44 = arith.addf %39, %43 : vector<32x24xf32>
    %c0_48 = arith.constant 0 : index
    %c0_49 = arith.constant 0 : index
    %45 = vector.load %arg7[%c0_48, %c0_49] : memref<1x24xf32, #tpu.memory_space<vmem>>, vector<1x24xf32>
    %46 = vector.broadcast %45 : vector<1x24xf32> to vector<32x24xf32>
    %47 = arith.addf %44, %46 : vector<32x24xf32>
    %cst_50 = arith.constant 0.000000e+00 : f32
    %48 = vector.broadcast %cst_50 : f32 to vector<32x24xf32>
    %49 = arith.maximumf %47, %48 : vector<32x24xf32>
    %c0_51 = arith.constant 0 : index
    %c0_52 = arith.constant 0 : index
    %50 = vector.load %arg8[%c0_51, %c0_52] : memref<24x384xf32, #tpu.memory_space<vmem>>, vector<24x384xf32>
    %cst_53 = arith.constant dense<0.000000e+00> : vector<32x384xf32>
    %51 = tpu.matmul %49, %50, %cst_53 {dimension_numbers = #tpu.dot_dimension_numbers<[1], [0], [0], [1], [0, 0, 1, 1], [], []>} : vector<32x24xf32>, vector<24x384xf32>, vector<32x384xf32> -> vector<32x384xf32>
    %c0_54 = arith.constant 0 : index
    %c0_55 = arith.constant 0 : index
    %52 = vector.load %arg9[%c0_54, %c0_55] : memref<32x384xf32, #tpu.memory_space<vmem>>, vector<32x384xf32>
    %53 = arith.mulf %51, %52 : vector<32x384xf32>
    %54 = vector.shape_cast %53 : vector<32x384xf32> to vector<2x16x384xf32>
    %cst_56 = arith.constant dense<0.000000e+00> : vector<2x384xf32>
    %55 = vector.multi_reduction <add>, %54, %cst_56 [1] : vector<2x16x384xf32> to vector<2x384xf32>
    %c0_57 = arith.constant 0 : index
    %c0_58 = arith.constant 0 : index
    %56 = vector.load %arg10[%c0_57, %c0_58] : memref<384x32xf32, #tpu.memory_space<vmem>>, vector<384x32xf32>
    %cst_59 = arith.constant dense<0.000000e+00> : vector<2x32xf32>
    %57 = tpu.matmul %55, %56, %cst_59 {dimension_numbers = #tpu.dot_dimension_numbers<[1], [0], [0], [1], [0, 0, 1, 1], [], []>} : vector<2x384xf32>, vector<384x32xf32>, vector<2x32xf32> -> vector<2x32xf32>
    %c0_60 = arith.constant 0 : index
    %c0_61 = arith.constant 0 : index
    %58 = vector.load %arg11[%c0_60, %c0_61] : memref<1x32xf32, #tpu.memory_space<vmem>>, vector<1x32xf32>
    %59 = vector.broadcast %58 : vector<1x32xf32> to vector<2x32xf32>
    %60 = arith.addf %57, %59 : vector<2x32xf32>
    %cst_62 = arith.constant 0.000000e+00 : f32
    %61 = vector.broadcast %cst_62 : f32 to vector<2x32xf32>
    %62 = arith.maximumf %60, %61 : vector<2x32xf32>
    %c0_63 = arith.constant 0 : index
    %c0_64 = arith.constant 0 : index
    %63 = vector.load %arg12[%c0_63, %c0_64] : memref<32x64xf32, #tpu.memory_space<vmem>>, vector<32x64xf32>
    %cst_65 = arith.constant dense<0.000000e+00> : vector<2x64xf32>
    %64 = tpu.matmul %62, %63, %cst_65 {dimension_numbers = #tpu.dot_dimension_numbers<[1], [0], [0], [1], [0, 0, 1, 1], [], []>} : vector<2x32xf32>, vector<32x64xf32>, vector<2x64xf32> -> vector<2x64xf32>
    %c0_66 = arith.constant 0 : index
    %c0_67 = arith.constant 0 : index
    %65 = vector.load %arg13[%c0_66, %c0_67] : memref<1x64xf32, #tpu.memory_space<vmem>>, vector<1x64xf32>
    %66 = vector.broadcast %65 : vector<1x64xf32> to vector<2x64xf32>
    %67 = arith.addf %64, %66 : vector<2x64xf32>
    %cst_68 = arith.constant 0.000000e+00 : f32
    %68 = vector.broadcast %cst_68 : f32 to vector<2x64xf32>
    %69 = arith.maximumf %67, %68 : vector<2x64xf32>
    %c0_69 = arith.constant 0 : index
    %c0_70 = arith.constant 0 : index
    %70 = vector.load %arg14[%c0_69, %c0_70] : memref<64x48xf32, #tpu.memory_space<vmem>>, vector<64x48xf32>
    %cst_71 = arith.constant dense<0.000000e+00> : vector<2x48xf32>
    %71 = tpu.matmul %69, %70, %cst_71 {dimension_numbers = #tpu.dot_dimension_numbers<[1], [0], [0], [1], [0, 0, 1, 1], [], []>} : vector<2x64xf32>, vector<64x48xf32>, vector<2x48xf32> -> vector<2x48xf32>
    %c0_72 = arith.constant 0 : index
    %c0_73 = arith.constant 0 : index
    %72 = vector.load %arg15[%c0_72, %c0_73] : memref<1x48xf32, #tpu.memory_space<vmem>>, vector<1x48xf32>
    %73 = vector.broadcast %72 : vector<1x48xf32> to vector<2x48xf32>
    %74 = arith.addf %71, %73 : vector<2x48xf32>
    %cst_74 = arith.constant 0.000000e+00 : f32
    %75 = vector.broadcast %cst_74 : f32 to vector<2x48xf32>
    %76 = arith.maximumf %74, %75 : vector<2x48xf32>
    %c0_75 = arith.constant 0 : index
    %c0_76 = arith.constant 0 : index
    %77 = vector.load %arg16[%c0_75, %c0_76] : memref<48x8xf32, #tpu.memory_space<vmem>>, vector<48x8xf32>
    %cst_77 = arith.constant dense<0.000000e+00> : vector<2x8xf32>
    %78 = tpu.matmul %76, %77, %cst_77 {dimension_numbers = #tpu.dot_dimension_numbers<[1], [0], [0], [1], [0, 0, 1, 1], [], []>} : vector<2x48xf32>, vector<48x8xf32>, vector<2x8xf32> -> vector<2x8xf32>
    %c0_78 = arith.constant 0 : index
    %c0_79 = arith.constant 0 : index
    %79 = vector.load %arg17[%c0_78, %c0_79] : memref<1x8xf32, #tpu.memory_space<vmem>>, vector<1x8xf32>
    %80 = vector.broadcast %79 : vector<1x8xf32> to vector<2x8xf32>
    %81 = arith.addf %78, %80 : vector<2x8xf32>
    %c0_80 = arith.constant 0 : index
    %c0_81 = arith.constant 0 : index
    %82 = vector.load %arg18[%c0_80, %c0_81] : memref<2x8xf32, #tpu.memory_space<vmem>>, vector<2x8xf32>
    tpu.vector_store %arg18[%c0_80, %c0_81], %81 {strides = array<i32>} : memref<2x8xf32, #tpu.memory_space<vmem>>, vector<2x8xf32>,
    return
  }
  func.func @transform_0(%arg0: i32) -> (i32, i32) {
    %c0_i32 = arith.constant 0 : i32
    %c0_i32_0 = arith.constant 0 : i32
    return %arg0, %c0_i32 : i32, i32
  }
  func.func @transform_1(%arg0: i32) -> (i32, i32) {
    %c0_i32 = arith.constant 0 : i32
    %c0_i32_0 = arith.constant 0 : i32
    %c0_i32_1 = arith.constant 0 : i32
    return %c0_i32, %c0_i32_0 : i32, i32
  }
  func.func @transform_2(%arg0: i32) -> (i32, i32) {
    %c0_i32 = arith.constant 0 : i32
    %c0_i32_0 = arith.constant 0 : i32
    %c0_i32_1 = arith.constant 0 : i32
    return %c0_i32, %c0_i32_0 : i32, i32
  }
  func.func @transform_3(%arg0: i32) -> (i32, i32, i32) {
    %c0_i32 = arith.constant 0 : i32
    %c0_i32_0 = arith.constant 0 : i32
    %c0_i32_1 = arith.constant 0 : i32
    %c0_i32_2 = arith.constant 0 : i32
    return %c0_i32, %c0_i32_0, %c0_i32_1 : i32, i32, i32
  }
  func.func @transform_4(%arg0: i32) -> (i32, i32) {
    %c0_i32 = arith.constant 0 : i32
    %c0_i32_0 = arith.constant 0 : i32
    %c0_i32_1 = arith.constant 0 : i32
    return %c0_i32, %c0_i32_0 : i32, i32
  }
  func.func @transform_5(%arg0: i32) -> (i32, i32, i32) {
    %c0_i32 = arith.constant 0 : i32
    %c0_i32_0 = arith.constant 0 : i32
    %c0_i32_1 = arith.constant 0 : i32
    %c0_i32_2 = arith.constant 0 : i32
    return %c0_i32, %c0_i32_0, %c0_i32_1 : i32, i32, i32
  }
  func.func @transform_6(%arg0: i32) -> (i32, i32) {
    %c0_i32 = arith.constant 0 : i32
    %c0_i32_0 = arith.constant 0 : i32
    %c0_i32_1 = arith.constant 0 : i32
    return %c0_i32, %c0_i32_0 : i32, i32
  }
  func.func @transform_7(%arg0: i32) -> (i32, i32) {
    %c0_i32 = arith.constant 0 : i32
    %c0_i32_0 = arith.constant 0 : i32
    %c0_i32_1 = arith.constant 0 : i32
    return %c0_i32, %c0_i32_0 : i32, i32
  }
  func.func @transform_8(%arg0: i32) -> (i32, i32) {
    %c0_i32 = arith.constant 0 : i32
    %c0_i32_0 = arith.constant 0 : i32
    %c0_i32_1 = arith.constant 0 : i32
    return %c0_i32, %c0_i32_0 : i32, i32
  }
  func.func @transform_9(%arg0: i32) -> (i32, i32) {
    %c0_i32 = arith.constant 0 : i32
    %c0_i32_0 = arith.constant 0 : i32
    %c0_i32_1 = arith.constant 0 : i32
    return %c0_i32, %c0_i32_0 : i32, i32
  }
  func.func @transform_10(%arg0: i32) -> (i32, i32) {
    %c0_i32 = arith.constant 0 : i32
    %c0_i32_0 = arith.constant 0 : i32
    %c0_i32_1 = arith.constant 0 : i32
    return %c0_i32, %c0_i32_0 : i32, i32
  }
  func.func @transform_11(%arg0: i32) -> (i32, i32) {
    %c0_i32 = arith.constant 0 : i32
    %c0_i32_0 = arith.constant 0 : i32
    %c0_i32_1 = arith.constant 0 : i32
    return %c0_i32, %c0_i32_0 : i32, i32
  }
  func.func @transform_12(%arg0: i32) -> (i32, i32) {
    %c0_i32 = arith.constant 0 : i32
    %c0_i32_0 = arith.constant 0 : i32
    %c0_i32_1 = arith.constant 0 : i32
    return %c0_i32, %c0_i32_0 : i32, i32
  }
  func.func @transform_13(%arg0: i32) -> (i32, i32) {
    %c0_i32 = arith.constant 0 : i32
    %c0_i32_0 = arith.constant 0 : i32
    %c0_i32_1 = arith.constant 0 : i32
    return %c0_i32, %c0_i32_0 : i32, i32
  }
  func.func @transform_14(%arg0: i32) -> (i32, i32) {
    %c0_i32 = arith.constant 0 : i32
    %c0_i32_0 = arith.constant 0 : i32
    %c0_i32_1 = arith.constant 0 : i32
    return %c0_i32, %c0_i32_0 : i32, i32
  }
  func.func @transform_15(%arg0: i32) -> (i32, i32) {
    %c0_i32 = arith.constant 0 : i32
    %c0_i32_0 = arith.constant 0 : i32
    %c0_i32_1 = arith.constant 0 : i32
    return %c0_i32, %c0_i32_0 : i32, i32
  }
  func.func @transform_16(%arg0: i32) -> (i32, i32) {
    %c0_i32 = arith.constant 0 : i32
    %c0_i32_0 = arith.constant 0 : i32
    %c0_i32_1 = arith.constant 0 : i32
    return %c0_i32, %c0_i32_0 : i32, i32
  }
  func.func @transform_17(%arg0: i32) -> (i32, i32) {
    %c0_i32 = arith.constant 0 : i32
    %c0_i32_0 = arith.constant 0 : i32
    return %arg0, %c0_i32 : i32, i32
  }
}

</mosaic_0001>

<bundles_post_ra>
// kernel: tpu_custom_call.1
= control target key start
LH: loop header
LB: loop body
LE: loop exit
PB: predicated region body
PF: predicated region fallthrough
CT: control target
= control target key end

     0   :  { %s3156_s0 = inlined_call_operand.vmem [shape: f32[32,64], index: 0, kind: input, shape index: {}]   ;;  %s3157_s1 = inlined_call_operand.vmem [shape: f32[64,128], index: 1, kind: input, shape index: {}]   ;;  %s3158_s2 = inlined_call_operand.vmem [shape: f32[1,128], index: 2, kind: input, shape index: {}]   ;;  %s3159_s3 = inlined_call_operand.vmem [shape: f32[3,128,56], index: 3, kind: input, shape index: {}]   ;;  %s3160_s4 = inlined_call_operand.vmem [shape: f32[1,56], index: 4, kind: input, shape index: {}]   ;;  %s3161_s5 = inlined_call_operand.vmem [shape: f32[3,56,24], index: 5, kind: input, shape index: {}]   ;;  %s3162_s6 = inlined_call_operand.vmem [shape: f32[1,24], index: 6, kind: input, shape index: {}]   ;;  %s3163_s7 = inlined_call_operand.vmem [shape: f32[24,384], index: 7, kind: input, shape index: {}]   ;;  %s3164_s8 = inlined_call_operand.vmem [shape: f32[32,384], index: 8, kind: input, shape index: {}]   ;;  %s3165_s9 = inlined_call_operand.vmem [shape: f32[384,32], index: 9, kind: input, shape index: {}]   ;;  %s3166_s10 = inlined_call_operand.vmem [shape: f32[1,32], index: 10, kind: input, shape index: {}]   ;;  %s3167_s11 = inlined_call_operand.vmem [shape: f32[32,64], index: 11, kind: input, shape index: {}]   ;;  %s3168_s12 = inlined_call_operand.vmem [shape: f32[1,64], index: 12, kind: input, shape index: {}]   ;;  %s3169_s13 = inlined_call_operand.vmem [shape: f32[64,48], index: 13, kind: input, shape index: {}]   ;;  %s3170_s14 = inlined_call_operand.vmem [shape: f32[1,48], index: 14, kind: input, shape index: {}]   ;;  %s3171_s15 = inlined_call_operand.vmem [shape: f32[48,8], index: 15, kind: input, shape index: {}]   ;;  %s3172_s16 = inlined_call_operand.vmem [shape: f32[1,8], index: 16, kind: input, shape index: {}]   ;;  %s3173_s17 = inlined_call_operand.hbm [shape: f32[2,8], index: 17, kind: output, shape index: {}]  }
   0x1   :  { %3176 = sst [smem:[#allocation7_spill]] %s3156_s0 }
   0x2   :  { %3177 = sst [smem:[#allocation8_spill]] %s3157_s1 }
   0x3   :  { %s3178_s26 = sld [smem:[#allocation8_spill]]  ;;  %vm76_vm0 = vcmask 523264   ;;  %s3179_s24 = sld [smem:[#allocation7_spill]]  ;;  %v1616_v9 = vld [vmem:[%s3159_s3 + $0x80] sm:$0xff]  ;;  %v1617_v10 = vld [vmem:[%s3159_s3 + $0x88] sm:$0xff]  ;;  %v1618_v11 = vld [vmem:[%s3159_s3 + $0x90] sm:$0xff] }
   0x4   :  { %v2180_v15 = vpack.c.bf16 %v1617_v10, %v1616_v9  ;;  %v1619_v16 = vld [vmem:[%s3159_s3 + $0x98] sm:$0xff]  ;;  %v1620_v18 = vld [vmem:[%s3159_s3 + $0xa0] sm:$0xff]  ;;  %v1621_v19 = vld [vmem:[%s3159_s3 + $0xa8] sm:$0xff] }
   0x5   :  { %v2184_v17 = vpack.c.bf16 %v1619_v16, %v1618_v11 }
   0x9   :  { %v61_v0 = vld [vmem:[%s3178_s26] sm:$0xff]  ;;  %v62_v1 = vld [vmem:[%s3178_s26 + $0x8] sm:$0xff]  ;;  %v63_v2 = vld [vmem:[%s3178_s26 + $0x10] sm:$0xff] }
   0xa   :  { %v2164_v3 = vpack.c.bf16 %v62_v1, %v61_v0  ;;  %v64_v4 = vld [vmem:[%s3178_s26 + $0x18] sm:$0xff]  ;;  %v65_v6 = vld [vmem:[%s3178_s26 + $0x20] sm:$0xff]  ;;  %v66_v7 = vld [vmem:[%s3178_s26 + $0x28] sm:$0xff] }
   0xb   :  { %v2168_v5 = vpack.c.bf16 %v64_v4, %v63_v2  ;;  %v57_v8 = vld [vmem:[%s3179_s24] sm:$0xff]  ;;  %v2172_v12 = vpack.c.bf16 %v66_v7, %v65_v6  ;;  %v67_v13 = vld [vmem:[%s3178_s26 + $0x30] sm:$0xff]  ;;  %v68_v14 = vld [vmem:[%s3178_s26 + $0x38] sm:$0xff] }
   0xc   :  { %2165 = vmatprep.subr.bf16.mxu0 %v2164_v3  ;;  %1892 = vmatprep.mubr.msk.f32.mxu0 %vm76_vm0, %v57_v8 }
   0xd   :  { %2167 = vmatpush3.bf16.msra.mxu0 %v2164_v3 }
   0xe   :  { %2169 = vmatprep.subr.bf16.mxu0 %v2168_v5 }
   0xf   :  { %22 = vsyncpa [#allocation5], 0  ;;  %2181 = vmatprep.subr.bf16.mxu1 %v2180_v15  ;;  %v2176_v20 = vpack.c.bf16 %v68_v14, %v67_v13  ;;  %v2188_v21 = vpack.c.bf16 %v1621_v19, %v1620_v18  ;;  %v1622_v22 = vld [vmem:[%s3159_s3 + $0xb0] sm:$0xff]  ;;  %v1623_v23 = vld [vmem:[%s3159_s3 + $0xb8] sm:$0xff]  ;;  %v2447_v39 = vmov 0.0   ;;  %vm515_vm1 = vcmask 457728  }
  0x10   :  { %2183 = vmatpush3.bf16.msra.mxu1 %v2180_v15  ;;  %v2192_v24 = vpack.c.bf16 %v1623_v23, %v1622_v22  ;;  %v58_v25 = vld [vmem:[%s3179_s24 + $0x8] sm:$0xff]  ;;  %v59_v26 = vld [vmem:[%s3179_s24 + $0x10] sm:$0xff]  ;;  %v60_v27 = vld [vmem:[%s3179_s24 + $0x18] sm:$0xff]  ;;  %182 = vst [vmem:[#allocation2 + $0x20] sm:$0xff] %v2447_v39  ;;  %vm871_vm2 = vcmask 195584   ;;  %vm2449_vm3 = vmmov 0  }
  0x11   :  { %2171 = vmatpush3.bf16.msra.mxu0 %v2168_v5  ;;  %2185 = vmatprep.subr.bf16.mxu1 %v2184_v17  ;;  %v1624_v28 = vld [vmem:[%s3159_s3 + $0xc0] sm:$0xff]  ;;  %v1625_v29 = vld [vmem:[%s3159_s3 + $0xc8] sm:$0xff]  ;;  %v1626_v31 = vld [vmem:[%s3159_s3 + $0xd0] sm:$0xff]  ;;  %520 = vst.msk [vmem:[#allocation3 + $0x20] sm:$0xff] %vm515_vm1, %v2447_v39  ;;  %vm1185_vm4 = vcmask 1041409   ;;  %vm1344_vm5 = vcmask 261120  }
  0x12   :  { %2173 = vmatprep.subr.bf16.mxu0 %v2172_v12  ;;  %v2196_v30 = vpack.c.bf16 %v1625_v29, %v1624_v28  ;;  %v1627_v32 = vld [vmem:[%s3159_s3 + $0xd8] sm:$0xff]  ;;  %v1628_v34 = vld [vmem:[%s3159_s3 + $0xe0] sm:$0xff]  ;;  %v1629_v35 = vld [vmem:[%s3159_s3 + $0xe8] sm:$0xff]  ;;  %vm1521_vm6 = vcmask 392192   ;;  %s2450_s22 = smov [#allocation4]   ;;  %vm1595_vm7 = vcmask 58368  }
  0x13   :  { %v2200_v33 = vpack.c.bf16 %v1627_v32, %v1626_v31  ;;  %v2204_v36 = vpack.c.bf16 %v1629_v35, %v1628_v34  ;;  %v1630_v37 = vld [vmem:[%s3159_s3 + $0xf0] sm:$0xff]  ;;  %v1631_v38 = vld [vmem:[%s3159_s3 + $0xf8] sm:$0xff]  ;;  %v183_v41 = vld [vmem:[%s3159_s3] sm:$0xff]  ;;  %s1603_s23 = sshll.u32 %s2450_s22, 4  ;;  %s1604_s23 = int_to_ptr.vmem [resolvable:$true] %s1603_s23 }
  0x14   :  { %2187 = vmatpush3.bf16.msra.mxu1 %v2184_v17  ;;  %v2208_v40 = vpack.c.bf16 %v1631_v38, %v1630_v37  ;;  %v184_v42 = vld [vmem:[%s3159_s3 + $0x8] sm:$0xff]  ;;  %v1611_v44 = vld [vmem:[%s3158_s2] ss:$0 sm:$0xff]  ;;  %v185_v58 = vld [vmem:[%s3159_s3 + $0x10] sm:$0xff]  ;;  %p2428_p1 = scmp.lt.s32.totalorder %s1604_s23, %s1604_s23 }
  0x15   :  { %2175 = vmatpush3.bf16.msra.mxu0 %v2172_v12  ;;  %2189 = vmatprep.subr.bf16.mxu1 %v2188_v21  ;;  %v2212_v43 = vpack.c.bf16 %v184_v42, %v183_v41  ;;  %v186_v59 = vld [vmem:[%s3159_s3 + $0x18] sm:$0xff]  ;;  %v187_v61 = vld [vmem:[%s3159_s3 + $0x20] sm:$0xff]  ;;  %v188_v0 = vld [vmem:[%s3159_s3 + $0x28] sm:$0xff] }
  0x16   :  { %2177 = vmatprep.subr.bf16.mxu0 %v2176_v20  ;;  %v2216_v60 = vpack.c.bf16 %v186_v59, %v185_v58  ;;  %v2220_v1 = vpack.c.bf16 %v188_v0, %v187_v61  ;;  %v189_v3 = vld [vmem:[%s3159_s3 + $0x30] sm:$0xff]  ;;  %v190_v4 = vld [vmem:[%s3159_s3 + $0x38] sm:$0xff]  ;;  %v191_v6 = vld [vmem:[%s3159_s3 + $0x40] sm:$0xff] }
  0x17   :  { %v2224_v5 = vpack.c.bf16 %v190_v4, %v189_v3  ;;  %v192_v7 = vld [vmem:[%s3159_s3 + $0x48] sm:$0xff]  ;;  %v193_v9 = vld [vmem:[%s3159_s3 + $0x50] sm:$0xff]  ;;  %v194_v10 = vld [vmem:[%s3159_s3 + $0x58] sm:$0xff] }
  0x18   :  { %2191 = vmatpush3.bf16.msra.mxu1 %v2188_v21  ;;  %v2228_v8 = vpack.c.bf16 %v192_v7, %v191_v6  ;;  %v2232_v11 = vpack.c.bf16 %v194_v10, %v193_v9  ;;  %v195_v12 = vld [vmem:[%s3159_s3 + $0x60] sm:$0xff]  ;;  %v196_v13 = vld [vmem:[%s3159_s3 + $0x68] sm:$0xff]  ;;  %v197_v15 = vld [vmem:[%s3159_s3 + $0x70] sm:$0xff] }
  0x19   :  { %2179 = vmatpush3.bf16.msra.mxu0 %v2176_v20  ;;  %2193 = vmatprep.subr.bf16.mxu1 %v2192_v24  ;;  %v2236_v14 = vpack.c.bf16 %v196_v13, %v195_v12  ;;  %v198_v16 = vld [vmem:[%s3159_s3 + $0x78] sm:$0xff]  ;;  %v1632_v18 = vld [vmem:[%s3159_s3 + $0x100] sm:$0xff]  ;;  %v1633_v19 = vld [vmem:[%s3159_s3 + $0x108] sm:$0xff] }
  0x1a   :  { %v2240_v17 = vpack.c.bf16 %v198_v16, %v197_v15  ;;  %v2244_v20 = vpack.c.bf16 %v1633_v19, %v1632_v18  ;;  %v1634_v21 = vld [vmem:[%s3159_s3 + $0x110] sm:$0xff]  ;;  %v1635_v22 = vld [vmem:[%s3159_s3 + $0x118] sm:$0xff]  ;;  %v1640_v31 = vld [vmem:[%s3159_s3 + $0x140] sm:$0xff] }
  0x1b   :  { %v2248_v23 = vpack.c.bf16 %v1635_v22, %v1634_v21  ;;  %v1639_v28 = vld [vmem:[%s3159_s3 + $0x138] sm:$0xff]  ;;  %v1641_v32 = vld [vmem:[%s3159_s3 + $0x148] sm:$0xff]  ;;  %v1642_v34 = vld [vmem:[%s3159_s3 + $0x150] sm:$0xff] }
  0x1c   :  { %1893 = vmatmul.mubr.msk.f32.vlgmr.msra.gmra.mrb[0].mxu0 %vm76_vm0, %v58_v25  ;;  %2195 = vmatpush3.bf16.msra.mxu1 %v2192_v24  ;;  %v1636_v24 = vld [vmem:[%s3159_s3 + $0x120] sm:$0xff]  ;;  %v1637_v25 = vld [vmem:[%s3159_s3 + $0x128] sm:$0xff]  ;;  %v1643_v35 = vld [vmem:[%s3159_s3 + $0x158] sm:$0xff] }
  0x1d   :  { %1895 = vmatprep.mubr.msk.f32.mxu0 %vm76_vm0, %v59_v26  ;;  %2197 = vmatprep.subr.bf16.mxu1 %v2196_v30  ;;  %v2252_v26 = vpack.c.bf16 %v1637_v25, %v1636_v24  ;;  %v1644_v37 = vld [vmem:[%s3159_s3 + $0x160] sm:$0xff]  ;;  %v1645_v38 = vld [vmem:[%s3159_s3 + $0x168] sm:$0xff]  ;;  %v1646_v41 = vld [vmem:[%s3159_s3 + $0x170] sm:$0xff] }
  0x1e   :  { %v1647_v42 = vld [vmem:[%s3159_s3 + $0x178] sm:$0xff]  ;;  %v522_v58 = vld [vmem:[%s3161_s5 + $0x8] sm:$0xff]  ;;  %v523_v10 = vld [vmem:[%s3161_s5 + $0x10] sm:$0xff] }
  0x1f   :  { %v525_v13 = vld [vmem:[%s3161_s5 + $0x20] sm:$0xff]  ;;  %v526_v16 = vld [vmem:[%s3161_s5 + $0x28] sm:$0xff]  ;;  %v527_v19 = vld [vmem:[%s3161_s5 + $0x30] sm:$0xff] }
  0x20   :  { %1896 = vmatmul.mubr.msk.f32.gmra.mrb[2].mxu0 %vm76_vm0, %v60_v27  ;;  %2199 = vmatpush3.bf16.msra.mxu1 %v2196_v30  ;;  %v1638_v27 = vld [vmem:[%s3159_s3 + $0x130] sm:$0xff]  ;;  %v1665_v21 = vld [vmem:[%s3161_s5 + $0x78] sm:$0xff]  ;;  %v1666_v22 = vld [vmem:[%s3161_s5 + $0x80] sm:$0xff] }
  0x21   :  { %2201 = vmatprep.subr.bf16.mxu1 %v2200_v33  ;;  %v2256_v30 = vpack.c.bf16 %v1639_v28, %v1638_v27  ;;  %v1669_v27 = vld [vmem:[%s3161_s5 + $0x98] sm:$0xff] }
  0x24   :  { %2203 = vmatpush3.bf16.msra.mxu1 %v2200_v33  ;;  %v2260_v33 = vpack.c.bf16 %v1641_v32, %v1640_v31  ;;  %v863_v31 = vld [vmem:[%s3163_s7 + $0x8] sm:$0xff]  ;;  %v866_v32 = vld [vmem:[%s3163_s7 + $0x20] sm:$0xff] }
  0x25   :  { %2205 = vmatprep.subr.bf16.mxu1 %v2204_v36 }
  0x28   :  { %2207 = vmatpush3.bf16.msra.mxu1 %v2204_v36  ;;  %v2264_v36 = vpack.c.bf16 %v1643_v35, %v1642_v34  ;;  %v865_v34 = vld [vmem:[%s3163_s7 + $0x18] sm:$0xff]  ;;  %v2312_v35 = vpack.c.bf16 %v866_v32, %v863_v31  ;;  %v1161_v31 = vld [vmem:[%s3165_s9 + $0x128] sm:$0xff]  ;;  %v1132_v32 = vld [vmem:[%s3165_s9 + $0x40] sm:$0xff] }
  0x29   :  { %2209 = vmatprep.subr.bf16.mxu1 %v2208_v40 }
  0x2c   :  { %2211 = vmatpush3.bf16.msra.mxu1 %v2208_v40  ;;  %v2268_v40 = vpack.c.bf16 %v1645_v38, %v1644_v37 }
  0x2d   :  { %2213 = vmatprep.subr.bf16.mxu1 %v2212_v43 }
  0xef   :  { %v1894_v45 = vpop.f32.mrb[0].mxu0 }
  0xf0   :  { %v2639_v46 = vadd.f32 %v1894_v45, %v1611_v44  ;;  %v155_v47 = vpop.f32.mrb[1].mxu0 }
  0xf1   :  { %v156_v48 = vadd.f32 %v1611_v44, %v155_v47  ;;  %v1649_v47 = vld [vmem:[%s3161_s5 + $0x38] sm:$0xff] }
  0xf2   :  { %v175_v49 = vmax.f32 %v2639_v46, 0.0 }
  0xf3   :  { %v174_v50 = vmax.f32 %v156_v48, 0.0  ;;  %v1897_v51 = vpop.f32.mrb[2].mxu0  ;;  %v1650_v48 = vld [vmem:[%s3161_s5 + $0x40] sm:$0xff] }
  0xf4   :  { %179 = vst [vmem:[#allocation2 + $0x8] sm:$0xff] %v175_v49  ;;  %v2644_v52 = vadd.f32 %v1897_v51, %v1611_v44  ;;  %v165_v53 = vpop.f32.mrb[3].mxu0  ;;  %v1652_v51 = vld [vmem:[%s3161_s5 + $0x50] sm:$0xff] }
  0xf5   :  { %178 = vst [vmem:[#allocation2] sm:$0xff] %v174_v50  ;;  %v166_v54 = vadd.f32 %v1611_v44, %v165_v53  ;;  %v1653_v53 = vld [vmem:[%s3161_s5 + $0x58] sm:$0xff] }
  0xf6   :  { %v177_v55 = vmax.f32 %v2644_v52, 0.0 }
  0xf7   :  { %v176_v56 = vmax.f32 %v166_v54, 0.0  ;;  %v1654_v54 = vld [vmem:[%s3161_s5 + $0x60] sm:$0xff] }
  0xf8   :  { %181 = vst [vmem:[#allocation2 + $0x18] sm:$0xff] %v177_v55 }
  0xf9   :  { %180 = vst [vmem:[#allocation2 + $0x10] sm:$0xff] %v176_v56 }
  0xfc   :  { %v199_v57 = vld [vmem:[#allocation2 + $0x1] sm:$0xff] }
  0xfd   :  { %1930 = vmatprep.mubr.f32.mxu1 %v199_v57  ;;  %v390_v29 = vld [vmem:[#allocation2 + $0x2] sm:$0xff] }
  0xfe   :  { %v521_v57 = vld [vmem:[%s3161_s5] sm:$0xff] }
  0xff   :  { %v202_v2 = vld [vmem:[#allocation2 + $0x19] sm:$0xff]  ;;  %v2288_v59 = vpack.c.bf16 %v522_v58, %v521_v57 }
 0x100   :  { %v200_v62 = vld [vmem:[#allocation2 + $0x9] sm:$0xff]  ;;  %v201_v63 = vld [vmem:[#allocation2 + $0x11] sm:$0xff]  ;;  %v393_v46 = vld [vmem:[#allocation2 + $0x1a] sm:$0xff] }
 0x101   :  { %1931 = vmatmul.mubr.f32.vlgmr.msra.gmra.mrb[0].mxu1 %v200_v62  ;;  %v391_v44 = vld [vmem:[#allocation2 + $0xa] sm:$0xff]  ;;  %v392_v45 = vld [vmem:[#allocation2 + $0x12] sm:$0xff] }
 0x102   :  { %2215 = vmatpush3.bf16.msra.mxu1 %v2212_v43  ;;  %1933 = vmatprep.mubr.f32.mxu1 %v201_v63  ;;  %v2272_v43 = vpack.c.bf16 %v1647_v42, %v1646_v41  ;;  %v869_v41 = vld [vmem:[%s3163_s7 + $0x38] sm:$0xff]  ;;  %v868_v42 = vld [vmem:[%s3163_s7 + $0x30] sm:$0xff] }
 0x103   :  { %2217 = vmatprep.subr.bf16.mxu1 %v2216_v60 }
 0x105   :  { %1934 = vmatmul.mubr.f32.gmra.mrb[2].mxu1 %v202_v2 }
 0x106   :  { %2219 = vmatpush3.bf16.msra.mxu1 %v2216_v60  ;;  %1968 = vmatprep.mubr.f32.mxu1 %v174_v50  ;;  %v1651_v50 = vld [vmem:[%s3161_s5 + $0x48] sm:$0xff]  ;;  %v1648_v60 = vld [vmem:[%s3160_s4] ss:$0 sm:$0xff] }
 0x107   :  { %2221 = vmatprep.subr.bf16.mxu1 %v2220_v1  ;;  %v2280_v52 = vpack.c.bf16 %v1652_v51, %v1651_v50 }
 0x10a   :  { %2223 = vmatpush3.bf16.msra.mxu1 %v2220_v1 }
 0x10b   :  { %2225 = vmatprep.subr.bf16.mxu1 %v2224_v5 }
 0x10e   :  { %2227 = vmatpush3.bf16.msra.mxu1 %v2224_v5 }
 0x10f   :  { %2229 = vmatprep.subr.bf16.mxu1 %v2228_v8 }
 0x112   :  { %2231 = vmatpush3.bf16.msra.mxu1 %v2228_v8 }
 0x113   :  { %2233 = vmatprep.subr.bf16.mxu1 %v2232_v11 }
 0x116   :  { %2235 = vmatpush3.bf16.msra.mxu1 %v2232_v11  ;;  %v524_v11 = vld [vmem:[%s3161_s5 + $0x18] sm:$0xff] }
 0x117   :  { %2237 = vmatprep.subr.bf16.mxu1 %v2236_v14  ;;  %v2292_v12 = vpack.c.bf16 %v524_v11, %v523_v10  ;;  %v1156_v11 = vld [vmem:[%s3165_s9 + $0x100] sm:$0xff] }
 0x11a   :  { %2239 = vmatpush3.bf16.msra.mxu1 %v2236_v14 }
 0x11b   :  { %2241 = vmatprep.subr.bf16.mxu1 %v2240_v17 }
 0x11e   :  { %2243 = vmatpush3.bf16.msra.mxu1 %v2240_v17  ;;  %v2296_v17 = vpack.c.bf16 %v526_v16, %v525_v13  ;;  %v1128_v13 = vld [vmem:[%s3165_s9 + $0x20] sm:$0xff]  ;;  %v1129_v16 = vld [vmem:[%s3165_s9 + $0x28] sm:$0xff] }
 0x11f   :  { %2245 = vmatprep.subr.bf16.mxu1 %v2244_v20 }
 0x121   :  { %1969 = vmatmul.mubr.f32.vlgmr.msra.gmra.mrb[0].mxu1 %v175_v49  ;;  %v2276_v49 = vpack.c.bf16 %v1650_v48, %v1649_v47 }
 0x122   :  { %1971 = vmatprep.mubr.f32.mxu1 %v176_v56  ;;  %2247 = vmatpush3.bf16.msra.mxu1 %v2244_v20  ;;  %v1655_v56 = vld [vmem:[%s3161_s5 + $0x68] sm:$0xff]  ;;  %v1664_v20 = vld [vmem:[%s3161_s5 + $0x70] sm:$0xff] }
 0x123   :  { %2249 = vmatprep.subr.bf16.mxu1 %v2248_v23  ;;  %2277 = vmatprep.subr.bf16.mxu0 %v2276_v49  ;;  %v2300_v24 = vpack.c.bf16 %v1665_v21, %v1664_v20  ;;  %v1158_v21 = vld [vmem:[%s3165_s9 + $0x110] sm:$0xff] }
 0x124   :  { %2279 = vmatpush3.bf16.msra.mxu0 %v2276_v49 }
 0x125   :  { %1972 = vmatmul.mubr.f32.gmra.mrb[2].mxu1 %v177_v55  ;;  %2281 = vmatprep.subr.bf16.mxu0 %v2280_v52  ;;  %v2284_v55 = vpack.c.bf16 %v1654_v54, %v1653_v53  ;;  %v870_v54 = vld [vmem:[%s3163_s7 + $0x40] sm:$0xff] }
 0x126   :  { %2251 = vmatpush3.bf16.msra.mxu1 %v2248_v23  ;;  %2006 = vmatprep.mubr.f32.mxu1 %v390_v29  ;;  %v1667_v23 = vld [vmem:[%s3161_s5 + $0x88] sm:$0xff] }
 0x127   :  { %2253 = vmatprep.subr.bf16.mxu1 %v2252_v26  ;;  %v2304_v25 = vpack.c.bf16 %v1667_v23, %v1666_v22  ;;  %v1159_v22 = vld [vmem:[%s3165_s9 + $0x118] sm:$0xff]  ;;  %v1130_v23 = vld [vmem:[%s3165_s9 + $0x30] sm:$0xff] }
 0x128   :  { %2283 = vmatpush3.bf16.msra.mxu0 %v2280_v52 }
 0x129   :  { %2285 = vmatprep.subr.bf16.mxu0 %v2284_v55 }
 0x12a   :  { %2255 = vmatpush3.bf16.msra.mxu1 %v2252_v26  ;;  %v1668_v26 = vld [vmem:[%s3161_s5 + $0x90] sm:$0xff] }
 0x12b   :  { %2257 = vmatprep.subr.bf16.mxu1 %v2256_v30  ;;  %v2308_v28 = vpack.c.bf16 %v1669_v27, %v1668_v26  ;;  %v1148_v27 = vld [vmem:[%s3165_s9 + $0xc0] sm:$0xff] }
 0x12c   :  { %2287 = vmatpush3.bf16.msra.mxu0 %v2284_v55 }
 0x12d   :  { %2024 = vmatprep.subr.mxu0 %v1655_v56 }
 0x12e   :  { %2259 = vmatpush3.bf16.msra.mxu1 %v2256_v30  ;;  %v1670_v30 = vld [vmem:[%s3161_s5 + $0xa0] sm:$0xff] }
 0x12f   :  { %2261 = vmatprep.subr.bf16.mxu1 %v2260_v33 }
 0x130   :  { %2025 = vmatpush3.msra.mxu0 %v1655_v56 }
 0x131   :  { %2289 = vmatprep.subr.bf16.mxu0 %v2288_v59 }
 0x132   :  { %2263 = vmatpush3.bf16.msra.mxu1 %v2260_v33  ;;  %v862_v33 = vld [vmem:[%s3163_s7] sm:$0xff] }
 0x133   :  { %2265 = vmatprep.subr.bf16.mxu1 %v2264_v36 }
 0x136   :  { %2267 = vmatpush3.bf16.msra.mxu1 %v2264_v36  ;;  %v2314_v36 = vpack.c.bf16 %v865_v34, %v862_v33  ;;  %v1133_v34 = vld [vmem:[%s3165_s9 + $0x48] sm:$0xff] }
 0x137   :  { %2269 = vmatprep.subr.bf16.mxu1 %v2268_v40 }
 0x13a   :  { %2271 = vmatpush3.bf16.msra.mxu1 %v2268_v40 }
 0x13b   :  { %2273 = vmatprep.subr.bf16.mxu1 %v2272_v43 }
 0x13e   :  { %2275 = vmatpush3.bf16.msra.mxu1 %v2272_v43  ;;  %v864_v43 = vld [vmem:[%s3163_s7 + $0x10] sm:$0xff] }
 0x141   :  { %2007 = vmatmul.mubr.f32.vlgmr.msra.gmra.mrb[0].mxu1 %v391_v44  ;;  %v867_v44 = vld [vmem:[%s3163_s7 + $0x28] sm:$0xff] }
 0x142   :  { %2009 = vmatprep.mubr.f32.mxu1 %v392_v45  ;;  %v2316_v45 = vpack.c.bf16 %v867_v44, %v864_v43  ;;  %v1135_v44 = vld [vmem:[%s3165_s9 + $0x58] sm:$0xff] }
 0x145   :  { %2010 = vmatmul.mubr.f32.gmra.mrb[2].mxu1 %v393_v46  ;;  %v1675_v46 = vld [vmem:[%s3162_s6] ss:$0 sm:$0xff] }
 0x146   :  { %2116 = vmatprep.mubr.msk.f32.mxu1 %vm2449_vm3, %v2447_v39 }
 0x214   :  { %v2008_v61 = vpop.f32.mrb[0].mxu1 }
 0x215   :  { %v508_v62 = vadd.f32 %v2008_v61, %v1648_v60  ;;  %v477_v63 = vpop.f32.mrb[1].mxu1  ;;  %v1141_v61 = vld [vmem:[%s3165_s9 + $0x88] sm:$0xff] }
 0x216   :  { %v507_v0 = vadd.f32 %v1648_v60, %v477_v63  ;;  %v1124_v63 = vld [vmem:[%s3165_s9] sm:$0xff] }
 0x217   :  { %v512_v1 = vmax.f32 %v508_v62, 0.0 }
 0x218   :  { %v511_v2 = vmax.f32 %v507_v0, 0.0  ;;  %v2011_v3 = vpop.f32.mrb[2].mxu1  ;;  %v1125_v0 = vld [vmem:[%s3165_s9 + $0x8] sm:$0xff] }
 0x219   :  { %517 = vst.msk [vmem:[#allocation3 + $0x8] sm:$0xff] %vm515_vm1, %v512_v1  ;;  %v510_v4 = vadd.f32 %v2011_v3, %v1648_v60  ;;  %v487_v5 = vpop.f32.mrb[3].mxu1  ;;  %v1143_v3 = vld [vmem:[%s3165_s9 + $0x98] sm:$0xff] }
 0x21a   :  { %516 = vst.msk [vmem:[#allocation3] sm:$0xff] %vm515_vm1, %v511_v2  ;;  %v509_v6 = vadd.f32 %v1648_v60, %v487_v5  ;;  %v1140_v60 = vld [vmem:[%s3165_s9 + $0x80] sm:$0xff]  ;;  %v1126_v5 = vld [vmem:[%s3165_s9 + $0x10] sm:$0xff] }
 0x21b   :  { %v514_v7 = vmax.f32 %v510_v4, 0.0  ;;  %v2320_v62 = vpack.c.bf16 %v1141_v61, %v1140_v60  ;;  %v1138_v60 = vld [vmem:[%s3165_s9 + $0x70] sm:$0xff]  ;;  %v1139_v61 = vld [vmem:[%s3165_s9 + $0x78] sm:$0xff] }
 0x21c   :  { %v513_v8 = vmax.f32 %v509_v6, 0.0  ;;  %v1127_v6 = vld [vmem:[%s3165_s9 + $0x18] sm:$0xff] }
 0x21d   :  { %519 = vst.msk [vmem:[#allocation3 + $0x18] sm:$0xff] %vm515_vm1, %v514_v7 }
 0x21e   :  { %518 = vst.msk [vmem:[#allocation3 + $0x10] sm:$0xff] %vm515_vm1, %v513_v8 }
 0x221   :  { %v528_v9 = vld [vmem:[#allocation3 + $0x1] sm:$0xff] }
 0x222   :  { %2026 = vmatprep.mubr.msk.f32.mxu0 %vm515_vm1, %v528_v9  ;;  %v734_v29 = vld [vmem:[#allocation3 + $0x2] sm:$0xff] }
 0x223   :  { %v1145_v9 = vld [vmem:[%s3165_s9 + $0xa8] sm:$0xff] }
 0x224   :  { %v531_v18 = vld [vmem:[#allocation3 + $0x19] sm:$0xff] }
 0x225   :  { %v529_v14 = vld [vmem:[#allocation3 + $0x9] sm:$0xff]  ;;  %v530_v15 = vld [vmem:[#allocation3 + $0x11] sm:$0xff]  ;;  %v737_v40 = vld [vmem:[#allocation3 + $0x1a] sm:$0xff] }
 0x226   :  { %2027 = vmatmul.mubr.msk.f32.vlgmr.msra.gmra.mrb[4].mxu0 %vm515_vm1, %v529_v14  ;;  %v735_v37 = vld [vmem:[#allocation3 + $0xa] sm:$0xff]  ;;  %v736_v38 = vld [vmem:[#allocation3 + $0x12] sm:$0xff]  ;;  %v2448_v14 = vmov 0.0|0.0  }
 0x227   :  { %2291 = vmatpush3.bf16.msra.mxu0 %v2288_v59  ;;  %2029 = vmatprep.mubr.msk.f32.mxu0 %vm515_vm1, %v530_v15 }
 0x228   :  { %2293 = vmatprep.subr.bf16.mxu0 %v2292_v12  ;;  %2352 = vmatprep.subr.bf16.mxu1 %v2448_v14 }
 0x22a   :  { %2030 = vmatmul.mubr.msk.f32.gmra.mrb[6].mxu0 %vm515_vm1, %v531_v18  ;;  %v1146_v18 = vld [vmem:[%s3165_s9 + $0xb0] sm:$0xff] }
 0x22b   :  { %2295 = vmatpush3.bf16.msra.mxu0 %v2292_v12  ;;  %2046 = vmatprep.mubr.msk.f32.mxu0 %vm515_vm1, %v511_v2  ;;  %v1142_v2 = vld [vmem:[%s3165_s9 + $0x90] sm:$0xff]  ;;  %v1157_v12 = vld [vmem:[%s3165_s9 + $0x108] sm:$0xff] }
 0x22c   :  { %2297 = vmatprep.subr.bf16.mxu0 %v2296_v17  ;;  %v2324_v4 = vpack.c.bf16 %v1143_v3, %v1142_v2  ;;  %v2353_v15 = vpack.c.bf16 %v1157_v12, %v1156_v11  ;;  %v1170_v3 = vld [vmem:[%s3165_s9 + $0x170] sm:$0xff]  ;;  %v1062_v11 = vld [vmem:[%s3164_s8 + $0x20] sm:$0xff] }
 0x22e   :  { %2354 = vmatpush3.bf16.msra.mxu1 %v2353_v15 }
 0x22f   :  { %2299 = vmatpush3.bf16.msra.mxu0 %v2296_v17  ;;  %v2330_v17 = vpack.c.bf16 %v1129_v16, %v1128_v13  ;;  %2355 = vmatprep.subr.bf16.mxu1 %v2448_v14 }
 0x230   :  { %2044 = vmatprep.subr.mxu0 %v527_v19 }
 0x233   :  { %2045 = vmatpush3.msra.mxu0 %v527_v19  ;;  %v1147_v19 = vld [vmem:[%s3165_s9 + $0xb8] sm:$0xff] }
 0x234   :  { %2047 = vmatmul.mubr.msk.f32.vlgmr.msra.gmra.mrb[4].mxu0 %vm515_vm1, %v512_v1  ;;  %2301 = vmatprep.subr.bf16.mxu0 %v2300_v24  ;;  %v2322_v1 = vpack.c.bf16 %v1125_v0, %v1124_v63  ;;  %v2332_v20 = vpack.c.bf16 %v1147_v19, %v1146_v18  ;;  %v2350_v63 = vpack.c.bf16 %v1139_v61, %v1138_v60  ;;  %v1168_v0 = vld [vmem:[%s3165_s9 + $0x160] sm:$0xff] }
 0x235   :  { %2049 = vmatprep.mubr.msk.f32.mxu0 %vm515_vm1, %v513_v8  ;;  %2303 = vmatpush3.bf16.msra.mxu0 %v2300_v24  ;;  %v1144_v8 = vld [vmem:[%s3165_s9 + $0xa0] sm:$0xff]  ;;  %v2356_v24 = vpack.c.bf16 %v1159_v22, %v1158_v21 }
 0x236   :  { %2305 = vmatprep.subr.bf16.mxu0 %v2304_v25  ;;  %v2328_v10 = vpack.c.bf16 %v1145_v9, %v1144_v8  ;;  %v1058_v8 = vld [vmem:[%s3164_s8] sm:$0xff]  ;;  %v1061_v9 = vld [vmem:[%s3164_s8 + $0x18] sm:$0xff] }
 0x237   :  { %2357 = vmatpush3.bf16.msra.mxu1 %v2356_v24 }
 0x238   :  { %2050 = vmatmul.mubr.msk.f32.gmra.mrb[6].mxu0 %vm515_vm1, %v514_v7  ;;  %v2326_v7 = vpack.c.bf16 %v1127_v6, %v1126_v5  ;;  %2358 = vmatprep.subr.bf16.mxu1 %v2448_v14 }
 0x239   :  { %2307 = vmatpush3.bf16.msra.mxu0 %v2304_v25  ;;  %2066 = vmatprep.mubr.msk.f32.mxu0 %vm515_vm1, %v734_v29  ;;  %v1131_v25 = vld [vmem:[%s3165_s9 + $0x38] sm:$0xff] }
 0x23a   :  { %2309 = vmatprep.subr.bf16.mxu0 %v2308_v28  ;;  %v2334_v26 = vpack.c.bf16 %v1131_v25, %v1130_v23  ;;  %v1064_v25 = vld [vmem:[%s3164_s8 + $0x30] sm:$0xff] }
 0x23d   :  { %2311 = vmatpush3.bf16.msra.mxu0 %v2308_v28  ;;  %v1149_v28 = vld [vmem:[%s3165_s9 + $0xc8] sm:$0xff] }
 0x23e   :  { %2064 = vmatprep.subr.mxu0 %v1670_v30  ;;  %v2336_v29 = vpack.c.bf16 %v1149_v28, %v1148_v27  ;;  %v1065_v28 = vld [vmem:[%s3164_s8 + $0x38] sm:$0xff] }
 0x241   :  { %2065 = vmatpush3.msra.mxu0 %v1670_v30  ;;  %v1160_v30 = vld [vmem:[%s3165_s9 + $0x120] sm:$0xff] }
 0x242   :  { %2067 = vmatmul.mubr.msk.f32.vlgmr.msra.gmra.mrb[4].mxu0 %vm515_vm1, %v735_v37  ;;  %2313 = vmatprep.subr.bf16.mxu0 %v2312_v35  ;;  %v2359_v33 = vpack.c.bf16 %v1161_v31, %v1160_v30  ;;  %v2338_v35 = vpack.c.bf16 %v1133_v34, %v1132_v32  ;;  %v1151_v37 = vld [vmem:[%s3165_s9 + $0xd8] sm:$0xff] }
 0x243   :  { %2069 = vmatprep.mubr.msk.f32.mxu0 %vm515_vm1, %v736_v38  ;;  %2315 = vmatpush1.bf16.msra.mxu0 %v2314_v36  ;;  %v1150_v36 = vld [vmem:[%s3165_s9 + $0xd0] sm:$0xff] }
 0x244   :  { %888 = vmatprep.subr.mxu0 %v869_v41  ;;  %2360 = vmatpush3.bf16.msra.mxu1 %v2359_v33  ;;  %v2340_v38 = vpack.c.bf16 %v1151_v37, %v1150_v36  ;;  %v1163_v41 = vld [vmem:[%s3165_s9 + $0x138] sm:$0xff]  ;;  %v1063_v37 = vld [vmem:[%s3164_s8 + $0x28] sm:$0xff] }
 0x245   :  { %2361 = vmatprep.subr.bf16.mxu1 %v2448_v14 }
 0x246   :  { %2070 = vmatmul.mubr.msk.f32.gmra.mrb[6].mxu0 %vm515_vm1, %v737_v40  ;;  %v1162_v40 = vld [vmem:[%s3165_s9 + $0x130] sm:$0xff] }
 0x247   :  { %948 = vmatprep.mubr.f32.mxu0 %v2447_v39  ;;  %889 = vmatpush1.msra.mxu0 %v868_v42  ;;  %v1134_v42 = vld [vmem:[%s3165_s9 + $0x50] sm:$0xff]  ;;  %v2362_v43 = vpack.c.bf16 %v1163_v41, %v1162_v40 }
 0x248   :  { %2317 = vmatprep.subr.bf16.mxu0 %v2316_v45  ;;  %v1060_v41 = vld [vmem:[%s3164_s8 + $0x10] sm:$0xff] }
 0x249   :  { %2363 = vmatpush3.bf16.msra.mxu1 %v2362_v43 }
 0x24a   :  { %2364 = vmatprep.subr.bf16.mxu1 %v2448_v14 }
 0x315   :  { %v2068_v47 = vpop.f32.mrb[4].mxu0 }
 0x316   :  { %v824_v48 = vpop.f32.mrb[5].mxu0  ;;  %v855_v50 = vadd.f32 %v2068_v47, %v1675_v46  ;;  %v1153_v47 = vld [vmem:[%s3165_s9 + $0xe8] sm:$0xff] }
 0x317   :  { %v854_v49 = vadd.f32 %v1675_v46, %v824_v48 }
 0x318   :  { %v859_v55 = vmax.f32 %v855_v50, 0.0  ;;  %v1165_v50 = vld [vmem:[%s3165_s9 + $0x148] sm:$0xff] }
 0x319   :  { %v858_v51 = vmax.f32 %v854_v49, 0.0  ;;  %v2071_v52 = vpop.f32.mrb[6].mxu0  ;;  %v1164_v49 = vld [vmem:[%s3165_s9 + $0x140] sm:$0xff] }
 0x31a   :  { %v834_v53 = vpop.f32.mrb[7].mxu0  ;;  %v857_v57 = vadd.f32 %v2071_v52, %v1675_v46  ;;  %v2365_v52 = vpack.c.bf16 %v1165_v50, %v1164_v49  ;;  %v1069_v50 = vld [vmem:[%s3164_s8 + $0x58] sm:$0xff] }
 0x31b   :  { %1676 = vmatmul.mubr.msk.f32.vlgmr.msra.gmra.mrb[8].mxu0 %vm871_vm2, %v858_v51  ;;  %v856_v56 = vadd.f32 %v1675_v46, %v834_v53  ;;  %v1152_v46 = vld [vmem:[%s3165_s9 + $0xe0] sm:$0xff]  ;;  %v1137_v53 = vld [vmem:[%s3165_s9 + $0x68] sm:$0xff] }
 0x31c   :  { %2319 = vmatpush3.bf16.msra.mxu0 %v2316_v45  ;;  %954 = vmatprep.mubr.f32.mxu0 %v2447_v39  ;;  %v861_v59 = vmax.f32 %v857_v57, 0.0  ;;  %v2342_v45 = vpack.c.bf16 %v1135_v44, %v1134_v42  ;;  %v2344_v48 = vpack.c.bf16 %v1153_v47, %v1152_v46  ;;  %v1166_v57 = vld [vmem:[%s3165_s9 + $0x150] sm:$0xff] }
 0x31d   :  { %2076 = vmatprep.subr.mxu0 %v870_v54  ;;  %v860_v58 = vmax.f32 %v856_v56, 0.0  ;;  %2366 = vmatpush3.bf16.msra.mxu1 %v2365_v52  ;;  %v1155_v56 = vld [vmem:[%s3165_s9 + $0xf8] sm:$0xff] }
 0x31e   :  { %2367 = vmatprep.subr.bf16.mxu1 %v2448_v14 }
 0x31f   :  { %1677 = vmatmul.mubr.msk.f32.gmra.mrb[10].mxu0 %vm871_vm2, %v859_v55 }
 0x320   :  { %960 = vmatprep.mubr.f32.mxu0 %v2447_v39  ;;  %2077 = vmatpush3.msra.mxu0 %v870_v54 }
 0x321   :  { %2321 = vmatprep.subr.bf16.mxu0 %v2320_v62 }
 0x323   :  { %1678 = vmatmul.mubr.msk.f32.gmra.mrb[12].mxu0 %vm871_vm2, %v860_v58 }
 0x324   :  { %966 = vmatprep.mubr.f32.mxu0 %v2447_v39 }
 0x327   :  { %1679 = vmatmul.mubr.msk.f32.gmra.mrb[14].mxu0 %vm871_vm2, %v861_v59 }
 0x328   :  { %2078 = vmatprep.mubr.msk.f32.mxu0 %vm871_vm2, %v858_v51  ;;  %v1136_v51 = vld [vmem:[%s3165_s9 + $0x60] sm:$0xff] }
 0x329   :  { %v2346_v54 = vpack.c.bf16 %v1137_v53, %v1136_v51  ;;  %v1066_v53 = vld [vmem:[%s3164_s8 + $0x40] sm:$0xff] }
 0x32b   :  { %2079 = vmatmul.mubr.msk.f32.vlgmr.msra.gmra.mrb[16].mxu0 %vm871_vm2, %v859_v55  ;;  %v1154_v55 = vld [vmem:[%s3165_s9 + $0xf0] sm:$0xff] }
 0x32c   :  { %2081 = vmatprep.mubr.msk.f32.mxu0 %vm871_vm2, %v860_v58  ;;  %2323 = vmatpush3.bf16.msra.mxu0 %v2322_v1  ;;  %v2348_v58 = vpack.c.bf16 %v1155_v56, %v1154_v55  ;;  %v1169_v1 = vld [vmem:[%s3165_s9 + $0x168] sm:$0xff] }
 0x32d   :  { %2325 = vmatprep.subr.bf16.mxu0 %v2324_v4  ;;  %v2371_v2 = vpack.c.bf16 %v1169_v1, %v1168_v0  ;;  %v1171_v4 = vld [vmem:[%s3165_s9 + $0x178] sm:$0xff] }
 0x32e   :  { %v2374_v5 = vpack.c.bf16 %v1171_v4, %v1170_v3 }
 0x32f   :  { %2082 = vmatmul.mubr.msk.f32.gmra.mrb[18].mxu0 %vm871_vm2, %v861_v59  ;;  %v1167_v59 = vld [vmem:[%s3165_s9 + $0x158] sm:$0xff] }
 0x330   :  { %2327 = vmatpush3.bf16.msra.mxu0 %v2326_v7  ;;  %v2368_v62 = vpack.c.bf16 %v1167_v59, %v1166_v57 }
 0x331   :  { %2329 = vmatprep.subr.bf16.mxu0 %v2328_v10  ;;  %v1059_v10 = vld [vmem:[%s3164_s8 + $0x8] sm:$0xff] }
 0x332   :  { %2369 = vmatpush3.bf16.msra.mxu1 %v2368_v62 }
 0x333   :  { %2370 = vmatprep.subr.bf16.mxu1 %v2448_v14 }
 0x334   :  { %2331 = vmatpush3.bf16.msra.mxu0 %v2330_v17 }
 0x335   :  { %2333 = vmatprep.subr.bf16.mxu0 %v2332_v20 }
 0x336   :  { %2372 = vmatpush3.bf16.msra.mxu1 %v2371_v2 }
 0x337   :  { %2373 = vmatprep.subr.bf16.mxu1 %v2448_v14 }
 0x338   :  { %2335 = vmatpush3.bf16.msra.mxu0 %v2334_v26  ;;  %v1067_v26 = vld [vmem:[%s3164_s8 + $0x48] sm:$0xff] }
 0x339   :  { %2337 = vmatprep.subr.bf16.mxu0 %v2336_v29  ;;  %v1068_v29 = vld [vmem:[%s3164_s8 + $0x50] sm:$0xff] }
 0x33a   :  { %2375 = vmatpush3.bf16.msra.mxu1 %v2374_v5 }
 0x33b   :  { %2394 = vmatprep.subr.bf16.mxu1 %v2448_v14 }
 0x33c   :  { %2339 = vmatpush3.bf16.msra.mxu0 %v2338_v35 }
 0x33d   :  { %2341 = vmatprep.subr.bf16.mxu0 %v2340_v38 }
 0x340   :  { %2343 = vmatpush3.bf16.msra.mxu0 %v2342_v45 }
 0x341   :  { %2345 = vmatprep.subr.bf16.mxu0 %v2344_v48 }
 0x344   :  { %2347 = vmatpush3.bf16.msra.mxu0 %v2346_v54 }
 0x345   :  { %2349 = vmatprep.subr.bf16.mxu0 %v2348_v58 }
 0x348   :  { %2351 = vmatpush3.bf16.msra.mxu0 %v2350_v63 }
 0x349   :  { %2376 = vmatprep.subr.bf16.mxu0 %v2448_v14 }
 0x3ee   :  { %v950_v6 = vpop.f32.mrb[8].mxu0 }
 0x3ef   :  { %v952_v7 = vpop.f32.mrb[9].mxu0  ;;  %v1070_v13 = vmul.f32 %v1058_v8, %v950_v6 }
 0x3f0   :  { %v1071_v17 = vmul.f32 %v1059_v10, %v952_v7 }
 0x3f2   :  { %v956_v12 = vpop.f32.mrb[10].mxu0 }
 0x3f3   :  { %v1073_v15 = vmul.f32 %v1061_v9, %v956_v12  ;;  %v958_v16 = vpop.f32.mrb[11].mxu0 }
 0x3f4   :  { %v1074_v18 = vmul.f32 %v1062_v11, %v958_v16 }
 0x3f5   :  { %v1082_v19 = vadd.f32 %v1073_v15, %v1070_v13 }
 0x3f6   :  { %v1089_v20 = vadd.f32 %v1074_v18, %v1071_v17  ;;  %v962_v21 = vpop.f32.mrb[12].mxu0 }
 0x3f7   :  { %v1083_v22 = vrot.slane %v1082_v19, 4  ;;  %v964_v23 = vpop.f32.mrb[13].mxu0  ;;  %v1076_v32 = vmul.f32 %v1064_v25, %v962_v21 }
 0x3f8   :  { %v1090_v24 = vrot.slane %v1089_v20, 4  ;;  %v1077_v35 = vmul.f32 %v1065_v28, %v964_v23 }
 0x3f9   :  { %v1084_v27 = vadd.f32 %v1083_v22, %v1082_v19 }
 0x3fa   :  { %v1091_v30 = vadd.f32 %v1090_v24, %v1089_v20  ;;  %v968_v31 = vpop.f32.mrb[14].mxu0 }
 0x3fb   :  { %v1079_v33 = vmul.f32 %v1067_v26, %v968_v31  ;;  %v970_v34 = vpop.f32.mrb[15].mxu0  ;;  %v1085_v38 = vrot.slane %v1084_v27, 2  ;;  %v1333_v26 = vld [vmem:[%s3167_s11] sm:$0xff] }
 0x3fc   :  { %v1080_v36 = vmul.f32 %v1068_v29, %v970_v34  ;;  %v1092_v42 = vrot.slane %v1091_v30, 2  ;;  %v1335_v29 = vld [vmem:[%s3167_s11 + $0x10] sm:$0xff] }
 0x3fd   :  { %v1103_v40 = vadd.f32 %v1079_v33, %v1076_v32  ;;  %v1086_v51 = vadd.f32 %v1085_v38, %v1084_v27  ;;  %v1334_v27 = vld [vmem:[%s3167_s11 + $0x8] sm:$0xff] }
 0x3fe   :  { %v1110_v43 = vadd.f32 %v1080_v36, %v1077_v35  ;;  %v2080_v44 = vpop.f32.mrb[16].mxu0  ;;  %v1093_v54 = vadd.f32 %v1092_v42, %v1091_v30  ;;  %v2377_v28 = vpack.c.bf16 %v1334_v27, %v1333_v26  ;;  %v1336_v30 = vld [vmem:[%s3167_s11 + $0x18] sm:$0xff]  ;;  %v1684_v35 = vld [vmem:[%s3166_s10] ss:$0 sm:$0xff]  ;;  %v1420_v38 = vld [vmem:[%s3169_s13 + $0x8] sm:$0xff] }
 0x3ff   :  { %v1104_v45 = vrot.slane %v1103_v40, 4  ;;  %v1075_v46 = vmul.f32 %v2080_v44, %v1063_v37  ;;  %v1039_v47 = vpop.f32.mrb[17].mxu0  ;;  %v1087_v0 = vrot.slane %v1086_v51, 1  ;;  %v2380_v31 = vpack.c.bf16 %v1336_v30, %v1335_v29  ;;  %v1419_v37 = vld [vmem:[%s3169_s13] sm:$0xff] }
 0x400   :  { %v1111_v48 = vrot.slane %v1110_v43, 4  ;;  %v1072_v49 = vmul.f32 %v1060_v41, %v1039_v47  ;;  %v1094_v5 = vrot.slane %v1093_v54, 1 }
 0x401   :  { %v1105_v52 = vadd.f32 %v1104_v45, %v1103_v40  ;;  %v1088_v10 = vadd.f32 %v1087_v0, %v1086_v51  ;;  %v1421_v45 = vld [vmem:[%s3169_s13 + $0x10] sm:$0xff]  ;;  %v1426_v51 = vld [vmem:[%s3169_s13 + $0x38] sm:$0xff]  ;;  %v1512_v0 = vld [vmem:[%s3171_s15 + $0x20] sm:$0xff] }
 0x402   :  { %v1112_v55 = vadd.f32 %v1111_v48, %v1110_v43  ;;  %v1096_v56 = vadd.f32 %v1075_v46, %v1072_v49  ;;  %v2083_v57 = vpop.f32.mrb[18].mxu0  ;;  %v1095_v15 = vadd.f32 %v1094_v5, %v1093_v54  ;;  %v2383_v43 = vpack.c.bf16 %v1420_v38, %v1419_v37  ;;  %v1422_v46 = vld [vmem:[%s3169_s13 + $0x18] sm:$0xff]  ;;  %v1423_v48 = vld [vmem:[%s3169_s13 + $0x20] sm:$0xff]  ;;  %v1424_v49 = vld [vmem:[%s3169_s13 + $0x28] sm:$0xff] }
 0x403   :  { %v1106_v58 = vrot.slane %v1105_v52, 2  ;;  %v1081_v59 = vmul.f32 %v2083_v57, %v1069_v50  ;;  %v1049_v60 = vpop.f32.mrb[19].mxu0  ;;  %v2386_v47 = vpack.c.bf16 %v1422_v46, %v1421_v45  ;;  %v2389_v50 = vpack.c.bf16 %v1424_v49, %v1423_v48  ;;  %v1509_v54 = vld [vmem:[%s3171_s15 + $0x8] sm:$0xff]  ;;  %v1511_v57 = vld [vmem:[%s3171_s15 + $0x18] sm:$0xff] }
 0x404   :  { %v1113_v61 = vrot.slane %v1112_v55, 2  ;;  %v1097_v62 = vrot.slane %v1096_v56, 4  ;;  %v1078_v63 = vmul.f32 %v1066_v53, %v1049_v60  ;;  %v1508_v53 = vld [vmem:[%s3171_s15] sm:$0xff] }
 0x405   :  { %v1107_v1 = vadd.f32 %v1106_v58, %v1105_v52 }
 0x406   :  { %v1114_v2 = vadd.f32 %v1113_v61, %v1112_v55  ;;  %v1098_v3 = vadd.f32 %v1097_v62, %v1096_v56  ;;  %v1117_v4 = vadd.f32 %v1081_v59, %v1078_v63  ;;  %v1510_v55 = vld [vmem:[%s3171_s15 + $0x10] sm:$0xff]  ;;  %v2395_v56 = vpack.c.bf16 %v1509_v54, %v1508_v53  ;;  %v1685_v59 = vld [vmem:[%s3168_s12] ss:$0 sm:$0xff] }
 0x407   :  { %v1108_v6 = vrot.slane %v1107_v1, 1  ;;  %v2398_v58 = vpack.c.bf16 %v1511_v57, %v1510_v55 }
 0x408   :  { %v1099_v7 = vrot.slane %v1098_v3, 2  ;;  %v1118_v8 = vrot.slane %v1117_v4, 4  ;;  %v1115_v9 = vrot.slane %v1114_v2, 1 }
 0x409   :  { %v1109_v11 = vadd.f32 %v1108_v6, %v1107_v1  ;;  %v1513_v1 = vld [vmem:[%s3171_s15 + $0x28] sm:$0xff]  ;;  %s2423_s15 = scalar_lea.vmem %s1604_s23, 32 }
 0x40a   :  { %v1100_v12 = vadd.f32 %v1099_v7, %v1098_v3  ;;  %v1119_v13 = vadd.f32 %v1118_v8, %v1117_v4  ;;  %v1116_v16 = vadd.f32 %v1115_v9, %v1114_v2  ;;  %v2401_v2 = vpack.c.bf16 %v1513_v1, %v1512_v0  ;;  %v1689_v7 = vld [vmem:[%s3172_s16] ss:$0 sm:$0xff]  ;;  %p2424_p0 = scmp.ne.s32.totalorder %s1604_s23, %s2423_s15  ;;  %p2429_p2 = scmp.lt.s32.totalorder %s2423_s15, %s2423_s15 }
 0x40b   :  { %v1186_v17 = vsel %vm1185_vm4, %v1109_v11, %v1088_v10 }
 0x40c   :  { %v1120_v18 = vrot.slane %v1119_v13, 2  ;;  %v1187_v19 = vsel %vm1185_vm4, %v1116_v16, %v1095_v15  ;;  %v1101_v20 = vrot.slane %v1100_v12, 1  ;;  %p2430_p3 = por %p2429_p2, %p2428_p1 }
 0x40d   :  { %1256 = vmatprep.mubr.f32.mxu0 %v1187_v19 }
 0x40e   :  { %v1121_v21 = vadd.f32 %v1120_v18, %v1119_v13  ;;  %1257 = vmatmul.mubr.f32.vlgmr.msra.gmra.mrb[20].mxu0 %v1186_v17  ;;  %v1102_v23 = vadd.f32 %v1101_v20, %v1100_v12  ;;  %p2431_p4 = pnand %p2430_p3, %p2424_p0 }
 0x40f   :  { %2127 = vmatprep.mubr.msk.f32.mxu0 %vm2449_vm3, %v2447_v39  ;;  %2378 = vmatpush3.bf16.msra.mxu0 %v2377_v28 }
 0x410   :  { %v1122_v22 = vrot.slane %v1121_v21, 1  ;;  %2379 = vmatprep.subr.bf16.mxu0 %v2448_v14 }
 0x412   :  { %v1123_v24 = vadd.f32 %v1122_v22, %v1121_v21 }
 0x413   :  { %2381 = vmatpush3.bf16.msra.mxu0 %v2380_v31 }
 0x414   :  { %v1188_v25 = vsel %vm1185_vm4, %v1123_v24, %v1102_v23  ;;  %2382 = vmatprep.subr.bf16.mxu0 %v2448_v14 }
 0x415   :  { %2117 = vmatmul.mubr.f32.vlgmr.msra.gmra.mrb[4].mxu1 %v1188_v25 }
 0x416   :  { %2161 = vmatprep.mubr.msk.f32.mxu1 %vm2449_vm3, %v2447_v39  ;;  %2396 = vmatpush3.bf16.msra.mxu1 %v2395_v56 }
 0x417   :  { %2397 = vmatprep.subr.bf16.mxu1 %v2448_v14 }
 0x41a   :  { %2399 = vmatpush3.bf16.msra.mxu1 %v2398_v58 }
 0x41b   :  { %2400 = vmatprep.subr.bf16.mxu1 %v2448_v14 }
 0x41e   :  { %2402 = vmatpush3.bf16.msra.mxu1 %v2401_v2 }
 0x4e1   :  { %v1835_v32 = vpop.f32.mrb[20].mxu0 }
 0x4e2   :  { %v1836_v33 = vpop.f32.mrb[21].mxu0 }
 0x4e3   :  { %v1837_v34 = vadd.f32 %v1836_v33, %v1835_v32 }
 0x4e5   :  { %v1259_v36 = vadd.f32 %v1837_v34, %v1684_v35 }
 0x4e8   :  { %v1328_v40 = vpop.f32.mrb[4].mxu1 }
 0x4e9   :  { %v1329_v41 = vadd.f32 %v1328_v40, %v1259_v36  ;;  %v2118_v42 = vpop.f32.mrb[5].mxu1 }
 0x4eb   :  { %v1332_v44 = vmax.f32 %v1329_v41, 0.0 }
 0x4ed   :  { %2128 = vmatmul.mubr.msk.f32.vlgmr.msra.gmra.mrb[22].mxu0 %vm1344_vm5, %v1332_v44 }
 0x4ee   :  { %2384 = vmatpush3.bf16.msra.mxu0 %v2383_v43  ;;  %2146 = vmatprep.mubr.msk.f32.mxu0 %vm2449_vm3, %v2447_v39  ;;  %v1425_v39 = vld [vmem:[%s3169_s13 + $0x30] sm:$0xff] }
 0x4ef   :  { %2385 = vmatprep.subr.bf16.mxu0 %v2448_v14  ;;  %v2392_v52 = vpack.c.bf16 %v1426_v51, %v1425_v39 }
 0x4f2   :  { %2387 = vmatpush3.bf16.msra.mxu0 %v2386_v47 }
 0x4f3   :  { %2388 = vmatprep.subr.bf16.mxu0 %v2448_v14 }
 0x4f6   :  { %2390 = vmatpush3.bf16.msra.mxu0 %v2389_v50 }
 0x4f7   :  { %2391 = vmatprep.subr.bf16.mxu0 %v2448_v14  ;;  %v1687_v14 = vld [vmem:[%s3170_s14] ss:$0 sm:$0xff] }
 0x4fa   :  { %2393 = vmatpush3.bf16.msra.mxu0 %v2392_v52 }
 0x5c0   :  { %v1414_v60 = vpop.f32.mrb[22].mxu0 }
 0x5c1   :  { %v1415_v61 = vadd.f32 %v1685_v59, %v1414_v60  ;;  %v2129_v62 = vpop.f32.mrb[23].mxu0 }
 0x5c3   :  { %v1418_v63 = vmax.f32 %v1415_v61, 0.0 }
 0x5c5   :  { %2147 = vmatmul.mubr.msk.f32.vlgmr.msra.gmra.mrb[24].mxu0 %vm76_vm0, %v1418_v63 }
 0x698   :  { %v1503_v3 = vpop.f32.mrb[24].mxu0 }
 0x699   :  { %v1504_v4 = vadd.f32 %v1687_v14, %v1503_v3  ;;  %v2148_v5 = vpop.f32.mrb[25].mxu0 }
 0x69b   :  { %v1507_v6 = vmax.f32 %v1504_v4, 0.0 }
 0x69d   :  { %2162 = vmatmul.mubr.msk.f32.vlgmr.msra.gmra.mrb[6].mxu1 %vm1521_vm6, %v1507_v6 }
 0x770   :  { %v1591_v8 = vpop.f32.mrb[6].mxu1 }
 0x771   :  { %v1592_v9 = vadd.f32 %v1689_v7, %v1591_v8  ;;  %v2163_v10 = vpop.f32.mrb[7].mxu1 }
 0x773   :  { %1596 = vst.msk [vmem:[#allocation4] sm:$0x3] %vm1595_vm7, %v1592_v9 }
 0x774   :  { %2434 = shalt.err (!%p2431_p4)
}
 0x775   :  { %s2435_s5 = scalar_lea.hbm %s3173_s17, 32 }
 0x776   :  { %p2436_p5 = scmp.ne.s32.totalorder %s3173_s17, %s2435_s5  ;;  %p2439_p6 = scmp.lt.u32.totalorder %s2435_s5, %s3173_s17 }
 0x778   :  { %p2441_p7 = pnand %p2439_p6, %p2436_p5 }
 0x77a   :  { %2444 = shalt.err (!%p2441_p7)
}
 0x77b   :  { %1606 = dma.vmem_to_hbm [thread:$0]  %s1604_s23, 32, %s3173_s17, [#allocation5]  }
 0x77c   :  { %2445 = dma.done.wait [#allocation5], 32  }
 0x77d   :  { %2446 = vsyncadd [#allocation5], 4294967264 }
 0x77e   :  { %1610 = vsyncpa [#allocation5], 1 }

</bundles_post_ra>
